<compile_context>
chip_gen: v7x
topology: tpu7x:2x2x1
jax: 0.10.0
libtpu: 0.0.40
codegen_flags: <defaults>
</compile_context>

<pallas_src>
import functools

import jax
import jax.numpy as jnp
from jax.experimental import pallas as pl
from jax.experimental.pallas import tpu as pltpu


def _tree_sum(terms):
    # Pairwise add tree: shortens the dependent-add chain on the serial path.
    while len(terms) > 1:
        nxt = [terms[i] + terms[i + 1] for i in range(0, len(terms) - 1, 2)]
        if len(terms) % 2:
            nxt.append(terms[-1])
        terms = nxt
    return terms[0]


def lstm_kernel(x_ref, w_ih0_ref, w_hh0_ref, b0_ref,
                w_ih1_ref, w_hh1_ref, b1_ref, w_lin_ref, b_lin_ref,
                out_ref, *, seq_len, batch):
    S, B = seq_len, batch
    I, SB = x_ref.shape                       # x is feature-major: (I, S*B)
    H4 = w_hh0_ref.shape[0]                   # weights feature-major: (4H, H) etc.
    H = H4 // 4
    O = out_ref.shape[0]
    assert SB == S * B

    # ---------------- Prologue (off the serial path) ----------------
    # Layer-0 input projection for ALL timesteps in one MXU op; bias folded in.
    xp = jnp.dot(w_ih0_ref[...], x_ref[...],
                 preferred_element_type=jnp.float32)          # (4H, S*B)
    xp = xp + jnp.broadcast_to(b0_ref[...], (H4, SB))

    # Hoist every loop-invariant broadcast out of the recurrence (JAX does not
    # CSE broadcast_in_dim): weight columns pre-broadcast to the (4H, B) gate tile.
    w_hh0 = w_hh0_ref[...]
    w_ih1 = w_ih1_ref[...]
    w_hh1 = w_hh1_ref[...]
    w_hh0_c = [jnp.broadcast_to(w_hh0[:, k:k + 1], (H4, B)) for k in range(H)]
    w_ih1_c = [jnp.broadcast_to(w_ih1[:, k:k + 1], (H4, B)) for k in range(H)]
    w_hh1_c = [jnp.broadcast_to(w_hh1[:, k:k + 1], (H4, B)) for k in range(H)]
    b1_b = jnp.broadcast_to(b1_ref[...], (H4, B))

    def nonlin(gates):
        # Gate rows were permuted in the wrapper to [i, f, o, g]: one contiguous
        # sigmoid block + one tanh block (2 EUP dispatches per layer).
        sig = jax.nn.sigmoid(gates[:3 * H, :])
        g = jnp.tanh(gates[3 * H:, :])
        return sig[:H, :], sig[H:2 * H, :], sig[2 * H:3 * H, :], g

    z = jnp.zeros((H, B), jnp.float32)
    h0, c0, h1, c1 = z, z, z, z
    h1s = []
    # Static Python loop: S is tiny and the whole live state is a few vregs, so
    # the entire recurrence stays in registers (no VMEM staging on the serial path).
    for t in range(S):
        xp_t = xp[:, t * B:(t + 1) * B]        # static slice of a live value
        # Layer 0: recurrent projection as a tree-summed VPU FMA chain (K = H);
        # no MXU push->pop round trip on the per-step critical path.
        # TODO(synk): on v7x, an MRB-resident-RHS MXU schedule is the alternative.
        g0 = _tree_sum([xp_t] + [w_hh0_c[k] * h0[k:k + 1, :] for k in range(H)])
        i0, f0, o0, gg0 = nonlin(g0)
        c0 = f0 * c0 + i0 * gg0
        h0 = o0 * jnp.tanh(c0)
        # Layer 1: input + recurrent projections with split weights — no per-step
        # lane concat of [h0, h1] on the serial path.
        g1 = _tree_sum([b1_b]
                       + [w_ih1_c[k] * h0[k:k + 1, :] for k in range(H)]
                       + [w_hh1_c[k] * h1[k:k + 1, :] for k in range(H)])
        i1, f1, o1, gg1 = nonlin(g1)
        c1 = f1 * c1 + i1 * gg1
        h1 = o1 * jnp.tanh(c1)
        h1s.append(h1)                         # stays in registers

    # ---------------- Epilogue (off the serial path) ----------------
    # Final Linear over all timesteps at once (H tiny -> FMA tree), output kept
    # feature-major (O, S*B) so the single slab store is lane-dense.
    h1_all = jnp.concatenate(h1s, axis=1)      # (H, S*B), column n = t*B + b
    w_lin = w_lin_ref[...]                     # (O, H)
    y = _tree_sum([jnp.broadcast_to(b_lin_ref[...], (O, SB))]
                  + [w_lin[:, h:h + 1] * h1_all[h:h + 1, :] for h in range(H)])
    out_ref[...] = y                           # one store, last dim = S*B


def _reorder_gates(w):
    # PyTorch gate order along the 4H axis is [i, f, g, o]; permute to [i, f, o, g]
    # so the kernel applies sigmoid/tanh on contiguous blocks.
    H4 = w.shape[-1]
    H = H4 // 4
    return jnp.concatenate(
        [w[..., :2 * H], w[..., 3 * H:], w[..., 2 * H:3 * H]], axis=-1)


def lstm_forward(x, params):
    S, B, I = x.shape
    H = params["w_hh0"].shape[0]
    O = params["w_lin"].shape[1]

    # One-time wrapper-side prep: gate-column permutation + feature-major
    # transposes so every in-kernel operand is a small 2-D tile.
    w_ih0 = _reorder_gates(params["w_ih0"]).T          # (4H, I)
    w_hh0 = _reorder_gates(params["w_hh0"]).T          # (4H, H)
    b0 = _reorder_gates(params["b0"]).T                # (4H, 1)
    w_ih1 = _reorder_gates(params["w_ih1"]).T          # (4H, H)
    w_hh1 = _reorder_gates(params["w_hh1"]).T          # (4H, H)
    b1 = _reorder_gates(params["b1"]).T                # (4H, 1)
    w_lin = params["w_lin"].T                          # (O, H)
    b_lin = params["b_lin"].T                          # (O, 1)

    # Flatten (S, B, I) -> feature-major (I, S*B); column n = t*B + b.
    x_fm = x.reshape(S * B, I).T

    args = (x_fm, w_ih0, w_hh0, b0, w_ih1, w_hh1, b1, w_lin, b_lin)
    vmem = lambda: pl.BlockSpec(memory_space=pltpu.MemorySpace.VMEM)
    # NOTE: at production S/B, stream over S with a sequential grid (h/c carried in
    # VMEM scratch) and add a leading batch-chunk axis with
    # dimension_semantics=("parallel", "arbitrary") for v7x megacore; budget the
    # S-chunk against v7x's 64 MiB VMEM. At these toy sizes everything fits at once.
    y_fm = pl.pallas_call(
        functools.partial(lstm_kernel, seq_len=S, batch=B),
        out_shape=jax.ShapeDtypeStruct((O, S * B), jnp.float32),
        in_specs=[vmem() for _ in args],
        out_specs=vmem(),
    )(*args)
    return y_fm.T.reshape(S, B, O)


def init_params(key, input_size=2, hidden_size=4, output_size=1):
    H = hidden_size
    k_lstm = 1.0 / jnp.sqrt(jnp.float32(H))
    k_lin = 1.0 / jnp.sqrt(jnp.float32(H))
    keys = jax.random.split(key, 10)

    def u(k, shape, bound):
        return jax.random.uniform(k, shape, jnp.float32, -bound, bound)

    # PyTorch stores W_ih as (4H, in); pre-transposed here to (in, 4H) for x @ W.
    w_ih0 = u(keys[0], (input_size, 4 * H), k_lstm)
    w_hh0 = u(keys[1], (H, 4 * H), k_lstm)
    b0 = (u(keys[2], (4 * H,), k_lstm) + u(keys[3], (4 * H,), k_lstm)).reshape(1, 4 * H)
    w_ih1 = u(keys[4], (H, 4 * H), k_lstm)
    w_hh1 = u(keys[5], (H, 4 * H), k_lstm)
    b1 = (u(keys[6], (4 * H,), k_lstm) + u(keys[7], (4 * H,), k_lstm)).reshape(1, 4 * H)
    w_lin = u(keys[8], (H, output_size), k_lin)
    b_lin = u(keys[9], (output_size,), k_lin).reshape(1, output_size)
    return dict(w_ih0=w_ih0, w_hh0=w_hh0, b0=b0,
                w_ih1=w_ih1, w_hh1=w_hh1, b1=b1,
                w_lin=w_lin, b_lin=b_lin)


def lstm_reference(x, params):
    # Pure-JAX reference with PyTorch nn.LSTM semantics (gate order [i, f, g, o]).
    S, B, _I = x.shape
    H = params["w_hh0"].shape[0]

    def cell(x_t, h, c, w_ih, w_hh, b):
        gates = x_t @ w_ih + h @ w_hh + b
        i = jax.nn.sigmoid(gates[:, 0 * H:1 * H])
        f = jax.nn.sigmoid(gates[:, 1 * H:2 * H])
        g = jnp.tanh(gates[:, 2 * H:3 * H])
        o = jax.nn.sigmoid(gates[:, 3 * H:4 * H])
        c = f * c + i * g
        return o * jnp.tanh(c), c

    h0 = c0 = h1 = c1 = jnp.zeros((B, H), jnp.float32)
    ys = []
    for t in range(S):
        h0, c0 = cell(x[t], h0, c0, params["w_ih0"], params["w_hh0"], params["b0"])
        h1, c1 = cell(h0, h1, c1, params["w_ih1"], params["w_hh1"], params["b1"])
        ys.append(h1 @ params["w_lin"] + params["b_lin"])
    return jnp.stack(ys, axis=0)


if __name__ == "__main__":
    jax.config.update("jax_default_matmul_precision", "highest")

    S, B, I = 8, 2, 2   # (seq, batch, input_size) — matches nn.LSTM(2, 4, 2) usage
    key = jax.random.PRNGKey(0)
    k_x, k_p = jax.random.split(key)
    x = jax.random.normal(k_x, (S, B, I), jnp.float32)
    params = init_params(k_p, input_size=I, hidden_size=4, output_size=1)

    y = lstm_forward(x, params)
    y = jax.block_until_ready(y)
    assert y.shape == (S, B, 1)

    y_ref = lstm_reference(x, params)
    assert jnp.allclose(y, y_ref, atol=1e-5, rtol=1e-5), \
        f"max abs diff {float(jnp.max(jnp.abs(y - y_ref)))}"
    print("KERNEL_OK")
</pallas_src>

<mosaic_0001>
module attributes {stable_mosaic.version = 11 : i64} {
  func.func @lstm_kernel(%arg0: memref<2x16xf32, #tpu.memory_space<vmem>>, %arg1: memref<16x2xf32, #tpu.memory_space<vmem>>, %arg2: memref<16x4xf32, #tpu.memory_space<vmem>>, %arg3: memref<16x1xf32, #tpu.memory_space<vmem>>, %arg4: memref<16x4xf32, #tpu.memory_space<vmem>>, %arg5: memref<16x4xf32, #tpu.memory_space<vmem>>, %arg6: memref<16x1xf32, #tpu.memory_space<vmem>>, %arg7: memref<1x4xf32, #tpu.memory_space<vmem>>, %arg8: memref<1x1xf32, #tpu.memory_space<vmem>>, %arg9: memref<1x16xf32, #tpu.memory_space<vmem>>) attributes {dimension_semantics = [], scalar_prefetch = 0 : i64, scratch_operands = 0 : i64, tpu.core_type = #tpu.core_type<tc>} {
    %c0 = arith.constant 0 : index
    %c0_0 = arith.constant 0 : index
    %0 = vector.load %arg1[%c0, %c0_0] : memref<16x2xf32, #tpu.memory_space<vmem>>, vector<16x2xf32>
    %c0_1 = arith.constant 0 : index
    %c0_2 = arith.constant 0 : index
    %1 = vector.load %arg0[%c0_1, %c0_2] : memref<2x16xf32, #tpu.memory_space<vmem>>, vector<2x16xf32>
    %cst = arith.constant dense<0.000000e+00> : vector<16x16xf32>
    %2 = tpu.matmul %0, %1, %cst {dimension_numbers = #tpu.dot_dimension_numbers<[1], [0], [0], [1], [0, 0, 1, 1], [], []>, precision = #tpu.contract_precision<fp32>} : vector<16x2xf32>, vector<2x16xf32>, vector<16x16xf32> -> vector<16x16xf32>
    %c0_3 = arith.constant 0 : index
    %c0_4 = arith.constant 0 : index
    %3 = vector.load %arg3[%c0_3, %c0_4] : memref<16x1xf32, #tpu.memory_space<vmem>>, vector<16x1xf32>
    %4 = vector.shape_cast %3 : vector<16x1xf32> to vector<16x1xf32>
    %5 = vector.broadcast %4 : vector<16x1xf32> to vector<16x16xf32>
    %6 = arith.addf %2, %5 : vector<16x16xf32>
    %c0_5 = arith.constant 0 : index
    %c0_6 = arith.constant 0 : index
    %7 = vector.load %arg2[%c0_5, %c0_6] : memref<16x4xf32, #tpu.memory_space<vmem>>, vector<16x4xf32>
    %c0_7 = arith.constant 0 : index
    %c0_8 = arith.constant 0 : index
    %8 = vector.load %arg4[%c0_7, %c0_8] : memref<16x4xf32, #tpu.memory_space<vmem>>, vector<16x4xf32>
    %c0_9 = arith.constant 0 : index
    %c0_10 = arith.constant 0 : index
    %9 = vector.load %arg5[%c0_9, %c0_10] : memref<16x4xf32, #tpu.memory_space<vmem>>, vector<16x4xf32>
    %10 = vector.extract_strided_slice %7 {offsets = [0, 0], sizes = [16, 1], strides = [1, 1]} : vector<16x4xf32> to vector<16x1xf32>
    %11 = vector.shape_cast %10 : vector<16x1xf32> to vector<16x1xf32>
    %12 = vector.broadcast %11 : vector<16x1xf32> to vector<16x2xf32>
    %13 = vector.extract_strided_slice %7 {offsets = [0, 1], sizes = [16, 1], strides = [1, 1]} : vector<16x4xf32> to vector<16x1xf32>
    %14 = vector.shape_cast %13 : vector<16x1xf32> to vector<16x1xf32>
    %15 = vector.broadcast %14 : vector<16x1xf32> to vector<16x2xf32>
    %16 = vector.extract_strided_slice %7 {offsets = [0, 2], sizes = [16, 1], strides = [1, 1]} : vector<16x4xf32> to vector<16x1xf32>
    %17 = vector.shape_cast %16 : vector<16x1xf32> to vector<16x1xf32>
    %18 = vector.broadcast %17 : vector<16x1xf32> to vector<16x2xf32>
    %19 = vector.extract_strided_slice %7 {offsets = [0, 3], sizes = [16, 1], strides = [1, 1]} : vector<16x4xf32> to vector<16x1xf32>
    %20 = vector.shape_cast %19 : vector<16x1xf32> to vector<16x1xf32>
    %21 = vector.broadcast %20 : vector<16x1xf32> to vector<16x2xf32>
    %22 = vector.extract_strided_slice %8 {offsets = [0, 0], sizes = [16, 1], strides = [1, 1]} : vector<16x4xf32> to vector<16x1xf32>
    %23 = vector.shape_cast %22 : vector<16x1xf32> to vector<16x1xf32>
    %24 = vector.broadcast %23 : vector<16x1xf32> to vector<16x2xf32>
    %25 = vector.extract_strided_slice %8 {offsets = [0, 1], sizes = [16, 1], strides = [1, 1]} : vector<16x4xf32> to vector<16x1xf32>
    %26 = vector.shape_cast %25 : vector<16x1xf32> to vector<16x1xf32>
    %27 = vector.broadcast %26 : vector<16x1xf32> to vector<16x2xf32>
    %28 = vector.extract_strided_slice %8 {offsets = [0, 2], sizes = [16, 1], strides = [1, 1]} : vector<16x4xf32> to vector<16x1xf32>
    %29 = vector.shape_cast %28 : vector<16x1xf32> to vector<16x1xf32>
    %30 = vector.broadcast %29 : vector<16x1xf32> to vector<16x2xf32>
    %31 = vector.extract_strided_slice %8 {offsets = [0, 3], sizes = [16, 1], strides = [1, 1]} : vector<16x4xf32> to vector<16x1xf32>
    %32 = vector.shape_cast %31 : vector<16x1xf32> to vector<16x1xf32>
    %33 = vector.broadcast %32 : vector<16x1xf32> to vector<16x2xf32>
    %34 = vector.extract_strided_slice %9 {offsets = [0, 0], sizes = [16, 1], strides = [1, 1]} : vector<16x4xf32> to vector<16x1xf32>
    %35 = vector.shape_cast %34 : vector<16x1xf32> to vector<16x1xf32>
    %36 = vector.broadcast %35 : vector<16x1xf32> to vector<16x2xf32>
    %37 = vector.extract_strided_slice %9 {offsets = [0, 1], sizes = [16, 1], strides = [1, 1]} : vector<16x4xf32> to vector<16x1xf32>
    %38 = vector.shape_cast %37 : vector<16x1xf32> to vector<16x1xf32>
    %39 = vector.broadcast %38 : vector<16x1xf32> to vector<16x2xf32>
    %40 = vector.extract_strided_slice %9 {offsets = [0, 2], sizes = [16, 1], strides = [1, 1]} : vector<16x4xf32> to vector<16x1xf32>
    %41 = vector.shape_cast %40 : vector<16x1xf32> to vector<16x1xf32>
    %42 = vector.broadcast %41 : vector<16x1xf32> to vector<16x2xf32>
    %43 = vector.extract_strided_slice %9 {offsets = [0, 3], sizes = [16, 1], strides = [1, 1]} : vector<16x4xf32> to vector<16x1xf32>
    %44 = vector.shape_cast %43 : vector<16x1xf32> to vector<16x1xf32>
    %45 = vector.broadcast %44 : vector<16x1xf32> to vector<16x2xf32>
    %c0_11 = arith.constant 0 : index
    %c0_12 = arith.constant 0 : index
    %46 = vector.load %arg6[%c0_11, %c0_12] : memref<16x1xf32, #tpu.memory_space<vmem>>, vector<16x1xf32>
    %47 = vector.shape_cast %46 : vector<16x1xf32> to vector<16x1xf32>
    %48 = vector.broadcast %47 : vector<16x1xf32> to vector<16x2xf32>
    %cst_13 = arith.constant 0.000000e+00 : f32
    %49 = vector.broadcast %cst_13 : f32 to vector<4x2xf32>
    %50 = vector.extract_strided_slice %6 {offsets = [0, 0], sizes = [16, 2], strides = [1, 1]} : vector<16x16xf32> to vector<16x2xf32>
    %51 = vector.extract_strided_slice %49 {offsets = [0, 0], sizes = [1, 2], strides = [1, 1]} : vector<4x2xf32> to vector<1x2xf32>
    %52 = vector.broadcast %51 : vector<1x2xf32> to vector<16x2xf32>
    %53 = arith.mulf %12, %52 : vector<16x2xf32>
    %54 = vector.extract_strided_slice %49 {offsets = [1, 0], sizes = [1, 2], strides = [1, 1]} : vector<4x2xf32> to vector<1x2xf32>
    %55 = vector.broadcast %54 : vector<1x2xf32> to vector<16x2xf32>
    %56 = arith.mulf %15, %55 : vector<16x2xf32>
    %57 = vector.extract_strided_slice %49 {offsets = [2, 0], sizes = [1, 2], strides = [1, 1]} : vector<4x2xf32> to vector<1x2xf32>
    %58 = vector.broadcast %57 : vector<1x2xf32> to vector<16x2xf32>
    %59 = arith.mulf %18, %58 : vector<16x2xf32>
    %60 = vector.extract_strided_slice %49 {offsets = [3, 0], sizes = [1, 2], strides = [1, 1]} : vector<4x2xf32> to vector<1x2xf32>
    %61 = vector.broadcast %60 : vector<1x2xf32> to vector<16x2xf32>
    %62 = arith.mulf %21, %61 : vector<16x2xf32>
    %63 = arith.addf %50, %53 : vector<16x2xf32>
    %64 = arith.addf %56, %59 : vector<16x2xf32>
    %65 = arith.addf %63, %64 : vector<16x2xf32>
    %66 = arith.addf %65, %62 : vector<16x2xf32>
    %67 = vector.extract_strided_slice %66 {offsets = [0, 0], sizes = [12, 2], strides = [1, 1]} : vector<16x2xf32> to vector<12x2xf32>
    %68 = arith.negf %67 : vector<12x2xf32>
    %69 = math.exp %68 : vector<12x2xf32>
    %cst_14 = arith.constant 1.000000e+00 : f32
    %70 = vector.broadcast %cst_14 : f32 to vector<12x2xf32>
    %71 = arith.addf %70, %69 : vector<12x2xf32>
    %72 = arith.divf %70, %71 : vector<12x2xf32>
    %73 = vector.extract_strided_slice %66 {offsets = [12, 0], sizes = [4, 2], strides = [1, 1]} : vector<16x2xf32> to vector<4x2xf32>
    %74 = math.tanh %73 : vector<4x2xf32>
    %75 = vector.extract_strided_slice %72 {offsets = [0, 0], sizes = [4, 2], strides = [1, 1]} : vector<12x2xf32> to vector<4x2xf32>
    %76 = vector.extract_strided_slice %72 {offsets = [4, 0], sizes = [4, 2], strides = [1, 1]} : vector<12x2xf32> to vector<4x2xf32>
    %77 = vector.extract_strided_slice %72 {offsets = [8, 0], sizes = [4, 2], strides = [1, 1]} : vector<12x2xf32> to vector<4x2xf32>
    %78 = arith.mulf %76, %49 : vector<4x2xf32>
    %79 = arith.mulf %75, %74 : vector<4x2xf32>
    %80 = arith.addf %78, %79 : vector<4x2xf32>
    %81 = math.tanh %80 : vector<4x2xf32>
    %82 = arith.mulf %77, %81 : vector<4x2xf32>
    %83 = vector.extract_strided_slice %82 {offsets = [0, 0], sizes = [1, 2], strides = [1, 1]} : vector<4x2xf32> to vector<1x2xf32>
    %84 = vector.broadcast %83 : vector<1x2xf32> to vector<16x2xf32>
    %85 = arith.mulf %24, %84 : vector<16x2xf32>
    %86 = vector.extract_strided_slice %82 {offsets = [1, 0], sizes = [1, 2], strides = [1, 1]} : vector<4x2xf32> to vector<1x2xf32>
    %87 = vector.broadcast %86 : vector<1x2xf32> to vector<16x2xf32>
    %88 = arith.mulf %27, %87 : vector<16x2xf32>
    %89 = vector.extract_strided_slice %82 {offsets = [2, 0], sizes = [1, 2], strides = [1, 1]} : vector<4x2xf32> to vector<1x2xf32>
    %90 = vector.broadcast %89 : vector<1x2xf32> to vector<16x2xf32>
    %91 = arith.mulf %30, %90 : vector<16x2xf32>
    %92 = vector.extract_strided_slice %82 {offsets = [3, 0], sizes = [1, 2], strides = [1, 1]} : vector<4x2xf32> to vector<1x2xf32>
    %93 = vector.broadcast %92 : vector<1x2xf32> to vector<16x2xf32>
    %94 = arith.mulf %33, %93 : vector<16x2xf32>
    %95 = vector.extract_strided_slice %49 {offsets = [0, 0], sizes = [1, 2], strides = [1, 1]} : vector<4x2xf32> to vector<1x2xf32>
    %96 = vector.broadcast %95 : vector<1x2xf32> to vector<16x2xf32>
    %97 = arith.mulf %36, %96 : vector<16x2xf32>
    %98 = vector.extract_strided_slice %49 {offsets = [1, 0], sizes = [1, 2], strides = [1, 1]} : vector<4x2xf32> to vector<1x2xf32>
    %99 = vector.broadcast %98 : vector<1x2xf32> to vector<16x2xf32>
    %100 = arith.mulf %39, %99 : vector<16x2xf32>
    %101 = vector.extract_strided_slice %49 {offsets = [2, 0], sizes = [1, 2], strides = [1, 1]} : vector<4x2xf32> to vector<1x2xf32>
    %102 = vector.broadcast %101 : vector<1x2xf32> to vector<16x2xf32>
    %103 = arith.mulf %42, %102 : vector<16x2xf32>
    %104 = vector.extract_strided_slice %49 {offsets = [3, 0], sizes = [1, 2], strides = [1, 1]} : vector<4x2xf32> to vector<1x2xf32>
    %105 = vector.broadcast %104 : vector<1x2xf32> to vector<16x2xf32>
    %106 = arith.mulf %45, %105 : vector<16x2xf32>
    %107 = arith.addf %48, %85 : vector<16x2xf32>
    %108 = arith.addf %88, %91 : vector<16x2xf32>
    %109 = arith.addf %94, %97 : vector<16x2xf32>
    %110 = arith.addf %100, %103 : vector<16x2xf32>
    %111 = arith.addf %107, %108 : vector<16x2xf32>
    %112 = arith.addf %109, %110 : vector<16x2xf32>
    %113 = arith.addf %111, %112 : vector<16x2xf32>
    %114 = arith.addf %113, %106 : vector<16x2xf32>
    %115 = vector.extract_strided_slice %114 {offsets = [0, 0], sizes = [12, 2], strides = [1, 1]} : vector<16x2xf32> to vector<12x2xf32>
    %116 = arith.negf %115 : vector<12x2xf32>
    %117 = math.exp %116 : vector<12x2xf32>
    %cst_15 = arith.constant 1.000000e+00 : f32
    %118 = vector.broadcast %cst_15 : f32 to vector<12x2xf32>
    %119 = arith.addf %118, %117 : vector<12x2xf32>
    %120 = arith.divf %118, %119 : vector<12x2xf32>
    %121 = vector.extract_strided_slice %114 {offsets = [12, 0], sizes = [4, 2], strides = [1, 1]} : vector<16x2xf32> to vector<4x2xf32>
    %122 = math.tanh %121 : vector<4x2xf32>
    %123 = vector.extract_strided_slice %120 {offsets = [0, 0], sizes = [4, 2], strides = [1, 1]} : vector<12x2xf32> to vector<4x2xf32>
    %124 = vector.extract_strided_slice %120 {offsets = [4, 0], sizes = [4, 2], strides = [1, 1]} : vector<12x2xf32> to vector<4x2xf32>
    %125 = vector.extract_strided_slice %120 {offsets = [8, 0], sizes = [4, 2], strides = [1, 1]} : vector<12x2xf32> to vector<4x2xf32>
    %126 = arith.mulf %124, %49 : vector<4x2xf32>
    %127 = arith.mulf %123, %122 : vector<4x2xf32>
    %128 = arith.addf %126, %127 : vector<4x2xf32>
    %129 = math.tanh %128 : vector<4x2xf32>
    %130 = arith.mulf %125, %129 : vector<4x2xf32>
    %131 = vector.extract_strided_slice %6 {offsets = [0, 2], sizes = [16, 2], strides = [1, 1]} : vector<16x16xf32> to vector<16x2xf32>
    %132 = vector.extract_strided_slice %82 {offsets = [0, 0], sizes = [1, 2], strides = [1, 1]} : vector<4x2xf32> to vector<1x2xf32>
    %133 = vector.broadcast %132 : vector<1x2xf32> to vector<16x2xf32>
    %134 = arith.mulf %12, %133 : vector<16x2xf32>
    %135 = vector.extract_strided_slice %82 {offsets = [1, 0], sizes = [1, 2], strides = [1, 1]} : vector<4x2xf32> to vector<1x2xf32>
    %136 = vector.broadcast %135 : vector<1x2xf32> to vector<16x2xf32>
    %137 = arith.mulf %15, %136 : vector<16x2xf32>
    %138 = vector.extract_strided_slice %82 {offsets = [2, 0], sizes = [1, 2], strides = [1, 1]} : vector<4x2xf32> to vector<1x2xf32>
    %139 = vector.broadcast %138 : vector<1x2xf32> to vector<16x2xf32>
    %140 = arith.mulf %18, %139 : vector<16x2xf32>
    %141 = vector.extract_strided_slice %82 {offsets = [3, 0], sizes = [1, 2], strides = [1, 1]} : vector<4x2xf32> to vector<1x2xf32>
    %142 = vector.broadcast %141 : vector<1x2xf32> to vector<16x2xf32>
    %143 = arith.mulf %21, %142 : vector<16x2xf32>
    %144 = arith.addf %131, %134 : vector<16x2xf32>
    %145 = arith.addf %137, %140 : vector<16x2xf32>
    %146 = arith.addf %144, %145 : vector<16x2xf32>
    %147 = arith.addf %146, %143 : vector<16x2xf32>
    %148 = vector.extract_strided_slice %147 {offsets = [0, 0], sizes = [12, 2], strides = [1, 1]} : vector<16x2xf32> to vector<12x2xf32>
    %149 = arith.negf %148 : vector<12x2xf32>
    %150 = math.exp %149 : vector<12x2xf32>
    %cst_16 = arith.constant 1.000000e+00 : f32
    %151 = vector.broadcast %cst_16 : f32 to vector<12x2xf32>
    %152 = arith.addf %151, %150 : vector<12x2xf32>
    %153 = arith.divf %151, %152 : vector<12x2xf32>
    %154 = vector.extract_strided_slice %147 {offsets = [12, 0], sizes = [4, 2], strides = [1, 1]} : vector<16x2xf32> to vector<4x2xf32>
    %155 = math.tanh %154 : vector<4x2xf32>
    %156 = vector.extract_strided_slice %153 {offsets = [0, 0], sizes = [4, 2], strides = [1, 1]} : vector<12x2xf32> to vector<4x2xf32>
    %157 = vector.extract_strided_slice %153 {offsets = [4, 0], sizes = [4, 2], strides = [1, 1]} : vector<12x2xf32> to vector<4x2xf32>
    %158 = vector.extract_strided_slice %153 {offsets = [8, 0], sizes = [4, 2], strides = [1, 1]} : vector<12x2xf32> to vector<4x2xf32>
    %159 = arith.mulf %157, %80 : vector<4x2xf32>
    %160 = arith.mulf %156, %155 : vector<4x2xf32>
    %161 = arith.addf %159, %160 : vector<4x2xf32>
    %162 = math.tanh %161 : vector<4x2xf32>
    %163 = arith.mulf %158, %162 : vector<4x2xf32>
    %164 = vector.extract_strided_slice %163 {offsets = [0, 0], sizes = [1, 2], strides = [1, 1]} : vector<4x2xf32> to vector<1x2xf32>
    %165 = vector.broadcast %164 : vector<1x2xf32> to vector<16x2xf32>
    %166 = arith.mulf %24, %165 : vector<16x2xf32>
    %167 = vector.extract_strided_slice %163 {offsets = [1, 0], sizes = [1, 2], strides = [1, 1]} : vector<4x2xf32> to vector<1x2xf32>
    %168 = vector.broadcast %167 : vector<1x2xf32> to vector<16x2xf32>
    %169 = arith.mulf %27, %168 : vector<16x2xf32>
    %170 = vector.extract_strided_slice %163 {offsets = [2, 0], sizes = [1, 2], strides = [1, 1]} : vector<4x2xf32> to vector<1x2xf32>
    %171 = vector.broadcast %170 : vector<1x2xf32> to vector<16x2xf32>
    %172 = arith.mulf %30, %171 : vector<16x2xf32>
    %173 = vector.extract_strided_slice %163 {offsets = [3, 0], sizes = [1, 2], strides = [1, 1]} : vector<4x2xf32> to vector<1x2xf32>
    %174 = vector.broadcast %173 : vector<1x2xf32> to vector<16x2xf32>
    %175 = arith.mulf %33, %174 : vector<16x2xf32>
    %176 = vector.extract_strided_slice %130 {offsets = [0, 0], sizes = [1, 2], strides = [1, 1]} : vector<4x2xf32> to vector<1x2xf32>
    %177 = vector.broadcast %176 : vector<1x2xf32> to vector<16x2xf32>
    %178 = arith.mulf %36, %177 : vector<16x2xf32>
    %179 = vector.extract_strided_slice %130 {offsets = [1, 0], sizes = [1, 2], strides = [1, 1]} : vector<4x2xf32> to vector<1x2xf32>
    %180 = vector.broadcast %179 : vector<1x2xf32> to vector<16x2xf32>
    %181 = arith.mulf %39, %180 : vector<16x2xf32>
    %182 = vector.extract_strided_slice %130 {offsets = [2, 0], sizes = [1, 2], strides = [1, 1]} : vector<4x2xf32> to vector<1x2xf32>
    %183 = vector.broadcast %182 : vector<1x2xf32> to vector<16x2xf32>
    %184 = arith.mulf %42, %183 : vector<16x2xf32>
    %185 = vector.extract_strided_slice %130 {offsets = [3, 0], sizes = [1, 2], strides = [1, 1]} : vector<4x2xf32> to vector<1x2xf32>
    %186 = vector.broadcast %185 : vector<1x2xf32> to vector<16x2xf32>
    %187 = arith.mulf %45, %186 : vector<16x2xf32>
    %188 = arith.addf %48, %166 : vector<16x2xf32>
    %189 = arith.addf %169, %172 : vector<16x2xf32>
    %190 = arith.addf %175, %178 : vector<16x2xf32>
    %191 = arith.addf %181, %184 : vector<16x2xf32>
    %192 = arith.addf %188, %189 : vector<16x2xf32>
    %193 = arith.addf %190, %191 : vector<16x2xf32>
    %194 = arith.addf %192, %193 : vector<16x2xf32>
    %195 = arith.addf %194, %187 : vector<16x2xf32>
    %196 = vector.extract_strided_slice %195 {offsets = [0, 0], sizes = [12, 2], strides = [1, 1]} : vector<16x2xf32> to vector<12x2xf32>
    %197 = arith.negf %196 : vector<12x2xf32>
    %198 = math.exp %197 : vector<12x2xf32>
    %cst_17 = arith.constant 1.000000e+00 : f32
    %199 = vector.broadcast %cst_17 : f32 to vector<12x2xf32>
    %200 = arith.addf %199, %198 : vector<12x2xf32>
    %201 = arith.divf %199, %200 : vector<12x2xf32>
    %202 = vector.extract_strided_slice %195 {offsets = [12, 0], sizes = [4, 2], strides = [1, 1]} : vector<16x2xf32> to vector<4x2xf32>
    %203 = math.tanh %202 : vector<4x2xf32>
    %204 = vector.extract_strided_slice %201 {offsets = [0, 0], sizes = [4, 2], strides = [1, 1]} : vector<12x2xf32> to vector<4x2xf32>
    %205 = vector.extract_strided_slice %201 {offsets = [4, 0], sizes = [4, 2], strides = [1, 1]} : vector<12x2xf32> to vector<4x2xf32>
    %206 = vector.extract_strided_slice %201 {offsets = [8, 0], sizes = [4, 2], strides = [1, 1]} : vector<12x2xf32> to vector<4x2xf32>
    %207 = arith.mulf %205, %128 : vector<4x2xf32>
    %208 = arith.mulf %204, %203 : vector<4x2xf32>
    %209 = arith.addf %207, %208 : vector<4x2xf32>
    %210 = math.tanh %209 : vector<4x2xf32>
    %211 = arith.mulf %206, %210 : vector<4x2xf32>
    %212 = vector.extract_strided_slice %6 {offsets = [0, 4], sizes = [16, 2], strides = [1, 1]} : vector<16x16xf32> to vector<16x2xf32>
    %213 = vector.extract_strided_slice %163 {offsets = [0, 0], sizes = [1, 2], strides = [1, 1]} : vector<4x2xf32> to vector<1x2xf32>
    %214 = vector.broadcast %213 : vector<1x2xf32> to vector<16x2xf32>
    %215 = arith.mulf %12, %214 : vector<16x2xf32>
    %216 = vector.extract_strided_slice %163 {offsets = [1, 0], sizes = [1, 2], strides = [1, 1]} : vector<4x2xf32> to vector<1x2xf32>
    %217 = vector.broadcast %216 : vector<1x2xf32> to vector<16x2xf32>
    %218 = arith.mulf %15, %217 : vector<16x2xf32>
    %219 = vector.extract_strided_slice %163 {offsets = [2, 0], sizes = [1, 2], strides = [1, 1]} : vector<4x2xf32> to vector<1x2xf32>
    %220 = vector.broadcast %219 : vector<1x2xf32> to vector<16x2xf32>
    %221 = arith.mulf %18, %220 : vector<16x2xf32>
    %222 = vector.extract_strided_slice %163 {offsets = [3, 0], sizes = [1, 2], strides = [1, 1]} : vector<4x2xf32> to vector<1x2xf32>
    %223 = vector.broadcast %222 : vector<1x2xf32> to vector<16x2xf32>
    %224 = arith.mulf %21, %223 : vector<16x2xf32>
    %225 = arith.addf %212, %215 : vector<16x2xf32>
    %226 = arith.addf %218, %221 : vector<16x2xf32>
    %227 = arith.addf %225, %226 : vector<16x2xf32>
    %228 = arith.addf %227, %224 : vector<16x2xf32>
    %229 = vector.extract_strided_slice %228 {offsets = [0, 0], sizes = [12, 2], strides = [1, 1]} : vector<16x2xf32> to vector<12x2xf32>
    %230 = arith.negf %229 : vector<12x2xf32>
    %231 = math.exp %230 : vector<12x2xf32>
    %cst_18 = arith.constant 1.000000e+00 : f32
    %232 = vector.broadcast %cst_18 : f32 to vector<12x2xf32>
    %233 = arith.addf %232, %231 : vector<12x2xf32>
    %234 = arith.divf %232, %233 : vector<12x2xf32>
    %235 = vector.extract_strided_slice %228 {offsets = [12, 0], sizes = [4, 2], strides = [1, 1]} : vector<16x2xf32> to vector<4x2xf32>
    %236 = math.tanh %235 : vector<4x2xf32>
    %237 = vector.extract_strided_slice %234 {offsets = [0, 0], sizes = [4, 2], strides = [1, 1]} : vector<12x2xf32> to vector<4x2xf32>
    %238 = vector.extract_strided_slice %234 {offsets = [4, 0], sizes = [4, 2], strides = [1, 1]} : vector<12x2xf32> to vector<4x2xf32>
    %239 = vector.extract_strided_slice %234 {offsets = [8, 0], sizes = [4, 2], strides = [1, 1]} : vector<12x2xf32> to vector<4x2xf32>
    %240 = arith.mulf %238, %161 : vector<4x2xf32>
    %241 = arith.mulf %237, %236 : vector<4x2xf32>
    %242 = arith.addf %240, %241 : vector<4x2xf32>
    %243 = math.tanh %242 : vector<4x2xf32>
    %244 = arith.mulf %239, %243 : vector<4x2xf32>
    %245 = vector.extract_strided_slice %244 {offsets = [0, 0], sizes = [1, 2], strides = [1, 1]} : vector<4x2xf32> to vector<1x2xf32>
    %246 = vector.broadcast %245 : vector<1x2xf32> to vector<16x2xf32>
    %247 = arith.mulf %24, %246 : vector<16x2xf32>
    %248 = vector.extract_strided_slice %244 {offsets = [1, 0], sizes = [1, 2], strides = [1, 1]} : vector<4x2xf32> to vector<1x2xf32>
    %249 = vector.broadcast %248 : vector<1x2xf32> to vector<16x2xf32>
    %250 = arith.mulf %27, %249 : vector<16x2xf32>
    %251 = vector.extract_strided_slice %244 {offsets = [2, 0], sizes = [1, 2], strides = [1, 1]} : vector<4x2xf32> to vector<1x2xf32>
    %252 = vector.broadcast %251 : vector<1x2xf32> to vector<16x2xf32>
    %253 = arith.mulf %30, %252 : vector<16x2xf32>
    %254 = vector.extract_strided_slice %244 {offsets = [3, 0], sizes = [1, 2], strides = [1, 1]} : vector<4x2xf32> to vector<1x2xf32>
    %255 = vector.broadcast %254 : vector<1x2xf32> to vector<16x2xf32>
    %256 = arith.mulf %33, %255 : vector<16x2xf32>
    %257 = vector.extract_strided_slice %211 {offsets = [0, 0], sizes = [1, 2], strides = [1, 1]} : vector<4x2xf32> to vector<1x2xf32>
    %258 = vector.broadcast %257 : vector<1x2xf32> to vector<16x2xf32>
    %259 = arith.mulf %36, %258 : vector<16x2xf32>
    %260 = vector.extract_strided_slice %211 {offsets = [1, 0], sizes = [1, 2], strides = [1, 1]} : vector<4x2xf32> to vector<1x2xf32>
    %261 = vector.broadcast %260 : vector<1x2xf32> to vector<16x2xf32>
    %262 = arith.mulf %39, %261 : vector<16x2xf32>
    %263 = vector.extract_strided_slice %211 {offsets = [2, 0], sizes = [1, 2], strides = [1, 1]} : vector<4x2xf32> to vector<1x2xf32>
    %264 = vector.broadcast %263 : vector<1x2xf32> to vector<16x2xf32>
    %265 = arith.mulf %42, %264 : vector<16x2xf32>
    %266 = vector.extract_strided_slice %211 {offsets = [3, 0], sizes = [1, 2], strides = [1, 1]} : vector<4x2xf32> to vector<1x2xf32>
    %267 = vector.broadcast %266 : vector<1x2xf32> to vector<16x2xf32>
    %268 = arith.mulf %45, %267 : vector<16x2xf32>
    %269 = arith.addf %48, %247 : vector<16x2xf32>
    %270 = arith.addf %250, %253 : vector<16x2xf32>
    %271 = arith.addf %256, %259 : vector<16x2xf32>
    %272 = arith.addf %262, %265 : vector<16x2xf32>
    %273 = arith.addf %269, %270 : vector<16x2xf32>
    %274 = arith.addf %271, %272 : vector<16x2xf32>
    %275 = arith.addf %273, %274 : vector<16x2xf32>
    %276 = arith.addf %275, %268 : vector<16x2xf32>
    %277 = vector.extract_strided_slice %276 {offsets = [0, 0], sizes = [12, 2], strides = [1, 1]} : vector<16x2xf32> to vector<12x2xf32>
    %278 = arith.negf %277 : vector<12x2xf32>
    %279 = math.exp %278 : vector<12x2xf32>
    %cst_19 = arith.constant 1.000000e+00 : f32
    %280 = vector.broadcast %cst_19 : f32 to vector<12x2xf32>
    %281 = arith.addf %280, %279 : vector<12x2xf32>
    %282 = arith.divf %280, %281 : vector<12x2xf32>
    %283 = vector.extract_strided_slice %276 {offsets = [12, 0], sizes = [4, 2], strides = [1, 1]} : vector<16x2xf32> to vector<4x2xf32>
    %284 = math.tanh %283 : vector<4x2xf32>
    %285 = vector.extract_strided_slice %282 {offsets = [0, 0], sizes = [4, 2], strides = [1, 1]} : vector<12x2xf32> to vector<4x2xf32>
    %286 = vector.extract_strided_slice %282 {offsets = [4, 0], sizes = [4, 2], strides = [1, 1]} : vector<12x2xf32> to vector<4x2xf32>
    %287 = vector.extract_strided_slice %282 {offsets = [8, 0], sizes = [4, 2], strides = [1, 1]} : vector<12x2xf32> to vector<4x2xf32>
    %288 = arith.mulf %286, %209 : vector<4x2xf32>
    %289 = arith.mulf %285, %284 : vector<4x2xf32>
    %290 = arith.addf %288, %289 : vector<4x2xf32>
    %291 = math.tanh %290 : vector<4x2xf32>
    %292 = arith.mulf %287, %291 : vector<4x2xf32>
    %293 = vector.extract_strided_slice %6 {offsets = [0, 6], sizes = [16, 2], strides = [1, 1]} : vector<16x16xf32> to vector<16x2xf32>
    %294 = vector.extract_strided_slice %244 {offsets = [0, 0], sizes = [1, 2], strides = [1, 1]} : vector<4x2xf32> to vector<1x2xf32>
    %295 = vector.broadcast %294 : vector<1x2xf32> to vector<16x2xf32>
    %296 = arith.mulf %12, %295 : vector<16x2xf32>
    %297 = vector.extract_strided_slice %244 {offsets = [1, 0], sizes = [1, 2], strides = [1, 1]} : vector<4x2xf32> to vector<1x2xf32>
    %298 = vector.broadcast %297 : vector<1x2xf32> to vector<16x2xf32>
    %299 = arith.mulf %15, %298 : vector<16x2xf32>
    %300 = vector.extract_strided_slice %244 {offsets = [2, 0], sizes = [1, 2], strides = [1, 1]} : vector<4x2xf32> to vector<1x2xf32>
    %301 = vector.broadcast %300 : vector<1x2xf32> to vector<16x2xf32>
    %302 = arith.mulf %18, %301 : vector<16x2xf32>
    %303 = vector.extract_strided_slice %244 {offsets = [3, 0], sizes = [1, 2], strides = [1, 1]} : vector<4x2xf32> to vector<1x2xf32>
    %304 = vector.broadcast %303 : vector<1x2xf32> to vector<16x2xf32>
    %305 = arith.mulf %21, %304 : vector<16x2xf32>
    %306 = arith.addf %293, %296 : vector<16x2xf32>
    %307 = arith.addf %299, %302 : vector<16x2xf32>
    %308 = arith.addf %306, %307 : vector<16x2xf32>
    %309 = arith.addf %308, %305 : vector<16x2xf32>
    %310 = vector.extract_strided_slice %309 {offsets = [0, 0], sizes = [12, 2], strides = [1, 1]} : vector<16x2xf32> to vector<12x2xf32>
    %311 = arith.negf %310 : vector<12x2xf32>
    %312 = math.exp %311 : vector<12x2xf32>
    %cst_20 = arith.constant 1.000000e+00 : f32
    %313 = vector.broadcast %cst_20 : f32 to vector<12x2xf32>
    %314 = arith.addf %313, %312 : vector<12x2xf32>
    %315 = arith.divf %313, %314 : vector<12x2xf32>
    %316 = vector.extract_strided_slice %309 {offsets = [12, 0], sizes = [4, 2], strides = [1, 1]} : vector<16x2xf32> to vector<4x2xf32>
    %317 = math.tanh %316 : vector<4x2xf32>
    %318 = vector.extract_strided_slice %315 {offsets = [0, 0], sizes = [4, 2], strides = [1, 1]} : vector<12x2xf32> to vector<4x2xf32>
    %319 = vector.extract_strided_slice %315 {offsets = [4, 0], sizes = [4, 2], strides = [1, 1]} : vector<12x2xf32> to vector<4x2xf32>
    %320 = vector.extract_strided_slice %315 {offsets = [8, 0], sizes = [4, 2], strides = [1, 1]} : vector<12x2xf32> to vector<4x2xf32>
    %321 = arith.mulf %319, %242 : vector<4x2xf32>
    %322 = arith.mulf %318, %317 : vector<4x2xf32>
    %323 = arith.addf %321, %322 : vector<4x2xf32>
    %324 = math.tanh %323 : vector<4x2xf32>
    %325 = arith.mulf %320, %324 : vector<4x2xf32>
    %326 = vector.extract_strided_slice %325 {offsets = [0, 0], sizes = [1, 2], strides = [1, 1]} : vector<4x2xf32> to vector<1x2xf32>
    %327 = vector.broadcast %326 : vector<1x2xf32> to vector<16x2xf32>
    %328 = arith.mulf %24, %327 : vector<16x2xf32>
    %329 = vector.extract_strided_slice %325 {offsets = [1, 0], sizes = [1, 2], strides = [1, 1]} : vector<4x2xf32> to vector<1x2xf32>
    %330 = vector.broadcast %329 : vector<1x2xf32> to vector<16x2xf32>
    %331 = arith.mulf %27, %330 : vector<16x2xf32>
    %332 = vector.extract_strided_slice %325 {offsets = [2, 0], sizes = [1, 2], strides = [1, 1]} : vector<4x2xf32> to vector<1x2xf32>
    %333 = vector.broadcast %332 : vector<1x2xf32> to vector<16x2xf32>
    %334 = arith.mulf %30, %333 : vector<16x2xf32>
    %335 = vector.extract_strided_slice %325 {offsets = [3, 0], sizes = [1, 2], strides = [1, 1]} : vector<4x2xf32> to vector<1x2xf32>
    %336 = vector.broadcast %335 : vector<1x2xf32> to vector<16x2xf32>
    %337 = arith.mulf %33, %336 : vector<16x2xf32>
    %338 = vector.extract_strided_slice %292 {offsets = [0, 0], sizes = [1, 2], strides = [1, 1]} : vector<4x2xf32> to vector<1x2xf32>
    %339 = vector.broadcast %338 : vector<1x2xf32> to vector<16x2xf32>
    %340 = arith.mulf %36, %339 : vector<16x2xf32>
    %341 = vector.extract_strided_slice %292 {offsets = [1, 0], sizes = [1, 2], strides = [1, 1]} : vector<4x2xf32> to vector<1x2xf32>
    %342 = vector.broadcast %341 : vector<1x2xf32> to vector<16x2xf32>
    %343 = arith.mulf %39, %342 : vector<16x2xf32>
    %344 = vector.extract_strided_slice %292 {offsets = [2, 0], sizes = [1, 2], strides = [1, 1]} : vector<4x2xf32> to vector<1x2xf32>
    %345 = vector.broadcast %344 : vector<1x2xf32> to vector<16x2xf32>
    %346 = arith.mulf %42, %345 : vector<16x2xf32>
    %347 = vector.extract_strided_slice %292 {offsets = [3, 0], sizes = [1, 2], strides = [1, 1]} : vector<4x2xf32> to vector<1x2xf32>
    %348 = vector.broadcast %347 : vector<1x2xf32> to vector<16x2xf32>
    %349 = arith.mulf %45, %348 : vector<16x2xf32>
    %350 = arith.addf %48, %328 : vector<16x2xf32>
    %351 = arith.addf %331, %334 : vector<16x2xf32>
    %352 = arith.addf %337, %340 : vector<16x2xf32>
    %353 = arith.addf %343, %346 : vector<16x2xf32>
    %354 = arith.addf %350, %351 : vector<16x2xf32>
    %355 = arith.addf %352, %353 : vector<16x2xf32>
    %356 = arith.addf %354, %355 : vector<16x2xf32>
    %357 = arith.addf %356, %349 : vector<16x2xf32>
    %358 = vector.extract_strided_slice %357 {offsets = [0, 0], sizes = [12, 2], strides = [1, 1]} : vector<16x2xf32> to vector<12x2xf32>
    %359 = arith.negf %358 : vector<12x2xf32>
    %360 = math.exp %359 : vector<12x2xf32>
    %cst_21 = arith.constant 1.000000e+00 : f32
    %361 = vector.broadcast %cst_21 : f32 to vector<12x2xf32>
    %362 = arith.addf %361, %360 : vector<12x2xf32>
    %363 = arith.divf %361, %362 : vector<12x2xf32>
    %364 = vector.extract_strided_slice %357 {offsets = [12, 0], sizes = [4, 2], strides = [1, 1]} : vector<16x2xf32> to vector<4x2xf32>
    %365 = math.tanh %364 : vector<4x2xf32>
    %366 = vector.extract_strided_slice %363 {offsets = [0, 0], sizes = [4, 2], strides = [1, 1]} : vector<12x2xf32> to vector<4x2xf32>
    %367 = vector.extract_strided_slice %363 {offsets = [4, 0], sizes = [4, 2], strides = [1, 1]} : vector<12x2xf32> to vector<4x2xf32>
    %368 = vector.extract_strided_slice %363 {offsets = [8, 0], sizes = [4, 2], strides = [1, 1]} : vector<12x2xf32> to vector<4x2xf32>
    %369 = arith.mulf %367, %290 : vector<4x2xf32>
    %370 = arith.mulf %366, %365 : vector<4x2xf32>
    %371 = arith.addf %369, %370 : vector<4x2xf32>
    %372 = math.tanh %371 : vector<4x2xf32>
    %373 = arith.mulf %368, %372 : vector<4x2xf32>
    %374 = vector.extract_strided_slice %6 {offsets = [0, 8], sizes = [16, 2], strides = [1, 1]} : vector<16x16xf32> to vector<16x2xf32>
    %375 = vector.extract_strided_slice %325 {offsets = [0, 0], sizes = [1, 2], strides = [1, 1]} : vector<4x2xf32> to vector<1x2xf32>
    %376 = vector.broadcast %375 : vector<1x2xf32> to vector<16x2xf32>
    %377 = arith.mulf %12, %376 : vector<16x2xf32>
    %378 = vector.extract_strided_slice %325 {offsets = [1, 0], sizes = [1, 2], strides = [1, 1]} : vector<4x2xf32> to vector<1x2xf32>
    %379 = vector.broadcast %378 : vector<1x2xf32> to vector<16x2xf32>
    %380 = arith.mulf %15, %379 : vector<16x2xf32>
    %381 = vector.extract_strided_slice %325 {offsets = [2, 0], sizes = [1, 2], strides = [1, 1]} : vector<4x2xf32> to vector<1x2xf32>
    %382 = vector.broadcast %381 : vector<1x2xf32> to vector<16x2xf32>
    %383 = arith.mulf %18, %382 : vector<16x2xf32>
    %384 = vector.extract_strided_slice %325 {offsets = [3, 0], sizes = [1, 2], strides = [1, 1]} : vector<4x2xf32> to vector<1x2xf32>
    %385 = vector.broadcast %384 : vector<1x2xf32> to vector<16x2xf32>
    %386 = arith.mulf %21, %385 : vector<16x2xf32>
    %387 = arith.addf %374, %377 : vector<16x2xf32>
    %388 = arith.addf %380, %383 : vector<16x2xf32>
    %389 = arith.addf %387, %388 : vector<16x2xf32>
    %390 = arith.addf %389, %386 : vector<16x2xf32>
    %391 = vector.extract_strided_slice %390 {offsets = [0, 0], sizes = [12, 2], strides = [1, 1]} : vector<16x2xf32> to vector<12x2xf32>
    %392 = arith.negf %391 : vector<12x2xf32>
    %393 = math.exp %392 : vector<12x2xf32>
    %cst_22 = arith.constant 1.000000e+00 : f32
    %394 = vector.broadcast %cst_22 : f32 to vector<12x2xf32>
    %395 = arith.addf %394, %393 : vector<12x2xf32>
    %396 = arith.divf %394, %395 : vector<12x2xf32>
    %397 = vector.extract_strided_slice %390 {offsets = [12, 0], sizes = [4, 2], strides = [1, 1]} : vector<16x2xf32> to vector<4x2xf32>
    %398 = math.tanh %397 : vector<4x2xf32>
    %399 = vector.extract_strided_slice %396 {offsets = [0, 0], sizes = [4, 2], strides = [1, 1]} : vector<12x2xf32> to vector<4x2xf32>
    %400 = vector.extract_strided_slice %396 {offsets = [4, 0], sizes = [4, 2], strides = [1, 1]} : vector<12x2xf32> to vector<4x2xf32>
    %401 = vector.extract_strided_slice %396 {offsets = [8, 0], sizes = [4, 2], strides = [1, 1]} : vector<12x2xf32> to vector<4x2xf32>
    %402 = arith.mulf %400, %323 : vector<4x2xf32>
    %403 = arith.mulf %399, %398 : vector<4x2xf32>
    %404 = arith.addf %402, %403 : vector<4x2xf32>
    %405 = math.tanh %404 : vector<4x2xf32>
    %406 = arith.mulf %401, %405 : vector<4x2xf32>
    %407 = vector.extract_strided_slice %406 {offsets = [0, 0], sizes = [1, 2], strides = [1, 1]} : vector<4x2xf32> to vector<1x2xf32>
    %408 = vector.broadcast %407 : vector<1x2xf32> to vector<16x2xf32>
    %409 = arith.mulf %24, %408 : vector<16x2xf32>
    %410 = vector.extract_strided_slice %406 {offsets = [1, 0], sizes = [1, 2], strides = [1, 1]} : vector<4x2xf32> to vector<1x2xf32>
    %411 = vector.broadcast %410 : vector<1x2xf32> to vector<16x2xf32>
    %412 = arith.mulf %27, %411 : vector<16x2xf32>
    %413 = vector.extract_strided_slice %406 {offsets = [2, 0], sizes = [1, 2], strides = [1, 1]} : vector<4x2xf32> to vector<1x2xf32>
    %414 = vector.broadcast %413 : vector<1x2xf32> to vector<16x2xf32>
    %415 = arith.mulf %30, %414 : vector<16x2xf32>
    %416 = vector.extract_strided_slice %406 {offsets = [3, 0], sizes = [1, 2], strides = [1, 1]} : vector<4x2xf32> to vector<1x2xf32>
    %417 = vector.broadcast %416 : vector<1x2xf32> to vector<16x2xf32>
    %418 = arith.mulf %33, %417 : vector<16x2xf32>
    %419 = vector.extract_strided_slice %373 {offsets = [0, 0], sizes = [1, 2], strides = [1, 1]} : vector<4x2xf32> to vector<1x2xf32>
    %420 = vector.broadcast %419 : vector<1x2xf32> to vector<16x2xf32>
    %421 = arith.mulf %36, %420 : vector<16x2xf32>
    %422 = vector.extract_strided_slice %373 {offsets = [1, 0], sizes = [1, 2], strides = [1, 1]} : vector<4x2xf32> to vector<1x2xf32>
    %423 = vector.broadcast %422 : vector<1x2xf32> to vector<16x2xf32>
    %424 = arith.mulf %39, %423 : vector<16x2xf32>
    %425 = vector.extract_strided_slice %373 {offsets = [2, 0], sizes = [1, 2], strides = [1, 1]} : vector<4x2xf32> to vector<1x2xf32>
    %426 = vector.broadcast %425 : vector<1x2xf32> to vector<16x2xf32>
    %427 = arith.mulf %42, %426 : vector<16x2xf32>
    %428 = vector.extract_strided_slice %373 {offsets = [3, 0], sizes = [1, 2], strides = [1, 1]} : vector<4x2xf32> to vector<1x2xf32>
    %429 = vector.broadcast %428 : vector<1x2xf32> to vector<16x2xf32>
    %430 = arith.mulf %45, %429 : vector<16x2xf32>
    %431 = arith.addf %48, %409 : vector<16x2xf32>
    %432 = arith.addf %412, %415 : vector<16x2xf32>
    %433 = arith.addf %418, %421 : vector<16x2xf32>
    %434 = arith.addf %424, %427 : vector<16x2xf32>
    %435 = arith.addf %431, %432 : vector<16x2xf32>
    %436 = arith.addf %433, %434 : vector<16x2xf32>
    %437 = arith.addf %435, %436 : vector<16x2xf32>
    %438 = arith.addf %437, %430 : vector<16x2xf32>
    %439 = vector.extract_strided_slice %438 {offsets = [0, 0], sizes = [12, 2], strides = [1, 1]} : vector<16x2xf32> to vector<12x2xf32>
    %440 = arith.negf %439 : vector<12x2xf32>
    %441 = math.exp %440 : vector<12x2xf32>
    %cst_23 = arith.constant 1.000000e+00 : f32
    %442 = vector.broadcast %cst_23 : f32 to vector<12x2xf32>
    %443 = arith.addf %442, %441 : vector<12x2xf32>
    %444 = arith.divf %442, %443 : vector<12x2xf32>
    %445 = vector.extract_strided_slice %438 {offsets = [12, 0], sizes = [4, 2], strides = [1, 1]} : vector<16x2xf32> to vector<4x2xf32>
    %446 = math.tanh %445 : vector<4x2xf32>
    %447 = vector.extract_strided_slice %444 {offsets = [0, 0], sizes = [4, 2], strides = [1, 1]} : vector<12x2xf32> to vector<4x2xf32>
    %448 = vector.extract_strided_slice %444 {offsets = [4, 0], sizes = [4, 2], strides = [1, 1]} : vector<12x2xf32> to vector<4x2xf32>
    %449 = vector.extract_strided_slice %444 {offsets = [8, 0], sizes = [4, 2], strides = [1, 1]} : vector<12x2xf32> to vector<4x2xf32>
    %450 = arith.mulf %448, %371 : vector<4x2xf32>
    %451 = arith.mulf %447, %446 : vector<4x2xf32>
    %452 = arith.addf %450, %451 : vector<4x2xf32>
    %453 = math.tanh %452 : vector<4x2xf32>
    %454 = arith.mulf %449, %453 : vector<4x2xf32>
    %455 = vector.extract_strided_slice %6 {offsets = [0, 10], sizes = [16, 2], strides = [1, 1]} : vector<16x16xf32> to vector<16x2xf32>
    %456 = vector.extract_strided_slice %406 {offsets = [0, 0], sizes = [1, 2], strides = [1, 1]} : vector<4x2xf32> to vector<1x2xf32>
    %457 = vector.broadcast %456 : vector<1x2xf32> to vector<16x2xf32>
    %458 = arith.mulf %12, %457 : vector<16x2xf32>
    %459 = vector.extract_strided_slice %406 {offsets = [1, 0], sizes = [1, 2], strides = [1, 1]} : vector<4x2xf32> to vector<1x2xf32>
    %460 = vector.broadcast %459 : vector<1x2xf32> to vector<16x2xf32>
    %461 = arith.mulf %15, %460 : vector<16x2xf32>
    %462 = vector.extract_strided_slice %406 {offsets = [2, 0], sizes = [1, 2], strides = [1, 1]} : vector<4x2xf32> to vector<1x2xf32>
    %463 = vector.broadcast %462 : vector<1x2xf32> to vector<16x2xf32>
    %464 = arith.mulf %18, %463 : vector<16x2xf32>
    %465 = vector.extract_strided_slice %406 {offsets = [3, 0], sizes = [1, 2], strides = [1, 1]} : vector<4x2xf32> to vector<1x2xf32>
    %466 = vector.broadcast %465 : vector<1x2xf32> to vector<16x2xf32>
    %467 = arith.mulf %21, %466 : vector<16x2xf32>
    %468 = arith.addf %455, %458 : vector<16x2xf32>
    %469 = arith.addf %461, %464 : vector<16x2xf32>
    %470 = arith.addf %468, %469 : vector<16x2xf32>
    %471 = arith.addf %470, %467 : vector<16x2xf32>
    %472 = vector.extract_strided_slice %471 {offsets = [0, 0], sizes = [12, 2], strides = [1, 1]} : vector<16x2xf32> to vector<12x2xf32>
    %473 = arith.negf %472 : vector<12x2xf32>
    %474 = math.exp %473 : vector<12x2xf32>
    %cst_24 = arith.constant 1.000000e+00 : f32
    %475 = vector.broadcast %cst_24 : f32 to vector<12x2xf32>
    %476 = arith.addf %475, %474 : vector<12x2xf32>
    %477 = arith.divf %475, %476 : vector<12x2xf32>
    %478 = vector.extract_strided_slice %471 {offsets = [12, 0], sizes = [4, 2], strides = [1, 1]} : vector<16x2xf32> to vector<4x2xf32>
    %479 = math.tanh %478 : vector<4x2xf32>
    %480 = vector.extract_strided_slice %477 {offsets = [0, 0], sizes = [4, 2], strides = [1, 1]} : vector<12x2xf32> to vector<4x2xf32>
    %481 = vector.extract_strided_slice %477 {offsets = [4, 0], sizes = [4, 2], strides = [1, 1]} : vector<12x2xf32> to vector<4x2xf32>
    %482 = vector.extract_strided_slice %477 {offsets = [8, 0], sizes = [4, 2], strides = [1, 1]} : vector<12x2xf32> to vector<4x2xf32>
    %483 = arith.mulf %481, %404 : vector<4x2xf32>
    %484 = arith.mulf %480, %479 : vector<4x2xf32>
    %485 = arith.addf %483, %484 : vector<4x2xf32>
    %486 = math.tanh %485 : vector<4x2xf32>
    %487 = arith.mulf %482, %486 : vector<4x2xf32>
    %488 = vector.extract_strided_slice %487 {offsets = [0, 0], sizes = [1, 2], strides = [1, 1]} : vector<4x2xf32> to vector<1x2xf32>
    %489 = vector.broadcast %488 : vector<1x2xf32> to vector<16x2xf32>
    %490 = arith.mulf %24, %489 : vector<16x2xf32>
    %491 = vector.extract_strided_slice %487 {offsets = [1, 0], sizes = [1, 2], strides = [1, 1]} : vector<4x2xf32> to vector<1x2xf32>
    %492 = vector.broadcast %491 : vector<1x2xf32> to vector<16x2xf32>
    %493 = arith.mulf %27, %492 : vector<16x2xf32>
    %494 = vector.extract_strided_slice %487 {offsets = [2, 0], sizes = [1, 2], strides = [1, 1]} : vector<4x2xf32> to vector<1x2xf32>
    %495 = vector.broadcast %494 : vector<1x2xf32> to vector<16x2xf32>
    %496 = arith.mulf %30, %495 : vector<16x2xf32>
    %497 = vector.extract_strided_slice %487 {offsets = [3, 0], sizes = [1, 2], strides = [1, 1]} : vector<4x2xf32> to vector<1x2xf32>
    %498 = vector.broadcast %497 : vector<1x2xf32> to vector<16x2xf32>
    %499 = arith.mulf %33, %498 : vector<16x2xf32>
    %500 = vector.extract_strided_slice %454 {offsets = [0, 0], sizes = [1, 2], strides = [1, 1]} : vector<4x2xf32> to vector<1x2xf32>
    %501 = vector.broadcast %500 : vector<1x2xf32> to vector<16x2xf32>
    %502 = arith.mulf %36, %501 : vector<16x2xf32>
    %503 = vector.extract_strided_slice %454 {offsets = [1, 0], sizes = [1, 2], strides = [1, 1]} : vector<4x2xf32> to vector<1x2xf32>
    %504 = vector.broadcast %503 : vector<1x2xf32> to vector<16x2xf32>
    %505 = arith.mulf %39, %504 : vector<16x2xf32>
    %506 = vector.extract_strided_slice %454 {offsets = [2, 0], sizes = [1, 2], strides = [1, 1]} : vector<4x2xf32> to vector<1x2xf32>
    %507 = vector.broadcast %506 : vector<1x2xf32> to vector<16x2xf32>
    %508 = arith.mulf %42, %507 : vector<16x2xf32>
    %509 = vector.extract_strided_slice %454 {offsets = [3, 0], sizes = [1, 2], strides = [1, 1]} : vector<4x2xf32> to vector<1x2xf32>
    %510 = vector.broadcast %509 : vector<1x2xf32> to vector<16x2xf32>
    %511 = arith.mulf %45, %510 : vector<16x2xf32>
    %512 = arith.addf %48, %490 : vector<16x2xf32>
    %513 = arith.addf %493, %496 : vector<16x2xf32>
    %514 = arith.addf %499, %502 : vector<16x2xf32>
    %515 = arith.addf %505, %508 : vector<16x2xf32>
    %516 = arith.addf %512, %513 : vector<16x2xf32>
    %517 = arith.addf %514, %515 : vector<16x2xf32>
    %518 = arith.addf %516, %517 : vector<16x2xf32>
    %519 = arith.addf %518, %511 : vector<16x2xf32>
    %520 = vector.extract_strided_slice %519 {offsets = [0, 0], sizes = [12, 2], strides = [1, 1]} : vector<16x2xf32> to vector<12x2xf32>
    %521 = arith.negf %520 : vector<12x2xf32>
    %522 = math.exp %521 : vector<12x2xf32>
    %cst_25 = arith.constant 1.000000e+00 : f32
    %523 = vector.broadcast %cst_25 : f32 to vector<12x2xf32>
    %524 = arith.addf %523, %522 : vector<12x2xf32>
    %525 = arith.divf %523, %524 : vector<12x2xf32>
    %526 = vector.extract_strided_slice %519 {offsets = [12, 0], sizes = [4, 2], strides = [1, 1]} : vector<16x2xf32> to vector<4x2xf32>
    %527 = math.tanh %526 : vector<4x2xf32>
    %528 = vector.extract_strided_slice %525 {offsets = [0, 0], sizes = [4, 2], strides = [1, 1]} : vector<12x2xf32> to vector<4x2xf32>
    %529 = vector.extract_strided_slice %525 {offsets = [4, 0], sizes = [4, 2], strides = [1, 1]} : vector<12x2xf32> to vector<4x2xf32>
    %530 = vector.extract_strided_slice %525 {offsets = [8, 0], sizes = [4, 2], strides = [1, 1]} : vector<12x2xf32> to vector<4x2xf32>
    %531 = arith.mulf %529, %452 : vector<4x2xf32>
    %532 = arith.mulf %528, %527 : vector<4x2xf32>
    %533 = arith.addf %531, %532 : vector<4x2xf32>
    %534 = math.tanh %533 : vector<4x2xf32>
    %535 = arith.mulf %530, %534 : vector<4x2xf32>
    %536 = vector.extract_strided_slice %6 {offsets = [0, 12], sizes = [16, 2], strides = [1, 1]} : vector<16x16xf32> to vector<16x2xf32>
    %537 = vector.extract_strided_slice %487 {offsets = [0, 0], sizes = [1, 2], strides = [1, 1]} : vector<4x2xf32> to vector<1x2xf32>
    %538 = vector.broadcast %537 : vector<1x2xf32> to vector<16x2xf32>
    %539 = arith.mulf %12, %538 : vector<16x2xf32>
    %540 = vector.extract_strided_slice %487 {offsets = [1, 0], sizes = [1, 2], strides = [1, 1]} : vector<4x2xf32> to vector<1x2xf32>
    %541 = vector.broadcast %540 : vector<1x2xf32> to vector<16x2xf32>
    %542 = arith.mulf %15, %541 : vector<16x2xf32>
    %543 = vector.extract_strided_slice %487 {offsets = [2, 0], sizes = [1, 2], strides = [1, 1]} : vector<4x2xf32> to vector<1x2xf32>
    %544 = vector.broadcast %543 : vector<1x2xf32> to vector<16x2xf32>
    %545 = arith.mulf %18, %544 : vector<16x2xf32>
    %546 = vector.extract_strided_slice %487 {offsets = [3, 0], sizes = [1, 2], strides = [1, 1]} : vector<4x2xf32> to vector<1x2xf32>
    %547 = vector.broadcast %546 : vector<1x2xf32> to vector<16x2xf32>
    %548 = arith.mulf %21, %547 : vector<16x2xf32>
    %549 = arith.addf %536, %539 : vector<16x2xf32>
    %550 = arith.addf %542, %545 : vector<16x2xf32>
    %551 = arith.addf %549, %550 : vector<16x2xf32>
    %552 = arith.addf %551, %548 : vector<16x2xf32>
    %553 = vector.extract_strided_slice %552 {offsets = [0, 0], sizes = [12, 2], strides = [1, 1]} : vector<16x2xf32> to vector<12x2xf32>
    %554 = arith.negf %553 : vector<12x2xf32>
    %555 = math.exp %554 : vector<12x2xf32>
    %cst_26 = arith.constant 1.000000e+00 : f32
    %556 = vector.broadcast %cst_26 : f32 to vector<12x2xf32>
    %557 = arith.addf %556, %555 : vector<12x2xf32>
    %558 = arith.divf %556, %557 : vector<12x2xf32>
    %559 = vector.extract_strided_slice %552 {offsets = [12, 0], sizes = [4, 2], strides = [1, 1]} : vector<16x2xf32> to vector<4x2xf32>
    %560 = math.tanh %559 : vector<4x2xf32>
    %561 = vector.extract_strided_slice %558 {offsets = [0, 0], sizes = [4, 2], strides = [1, 1]} : vector<12x2xf32> to vector<4x2xf32>
    %562 = vector.extract_strided_slice %558 {offsets = [4, 0], sizes = [4, 2], strides = [1, 1]} : vector<12x2xf32> to vector<4x2xf32>
    %563 = vector.extract_strided_slice %558 {offsets = [8, 0], sizes = [4, 2], strides = [1, 1]} : vector<12x2xf32> to vector<4x2xf32>
    %564 = arith.mulf %562, %485 : vector<4x2xf32>
    %565 = arith.mulf %561, %560 : vector<4x2xf32>
    %566 = arith.addf %564, %565 : vector<4x2xf32>
    %567 = math.tanh %566 : vector<4x2xf32>
    %568 = arith.mulf %563, %567 : vector<4x2xf32>
    %569 = vector.extract_strided_slice %568 {offsets = [0, 0], sizes = [1, 2], strides = [1, 1]} : vector<4x2xf32> to vector<1x2xf32>
    %570 = vector.broadcast %569 : vector<1x2xf32> to vector<16x2xf32>
    %571 = arith.mulf %24, %570 : vector<16x2xf32>
    %572 = vector.extract_strided_slice %568 {offsets = [1, 0], sizes = [1, 2], strides = [1, 1]} : vector<4x2xf32> to vector<1x2xf32>
    %573 = vector.broadcast %572 : vector<1x2xf32> to vector<16x2xf32>
    %574 = arith.mulf %27, %573 : vector<16x2xf32>
    %575 = vector.extract_strided_slice %568 {offsets = [2, 0], sizes = [1, 2], strides = [1, 1]} : vector<4x2xf32> to vector<1x2xf32>
    %576 = vector.broadcast %575 : vector<1x2xf32> to vector<16x2xf32>
    %577 = arith.mulf %30, %576 : vector<16x2xf32>
    %578 = vector.extract_strided_slice %568 {offsets = [3, 0], sizes = [1, 2], strides = [1, 1]} : vector<4x2xf32> to vector<1x2xf32>
    %579 = vector.broadcast %578 : vector<1x2xf32> to vector<16x2xf32>
    %580 = arith.mulf %33, %579 : vector<16x2xf32>
    %581 = vector.extract_strided_slice %535 {offsets = [0, 0], sizes = [1, 2], strides = [1, 1]} : vector<4x2xf32> to vector<1x2xf32>
    %582 = vector.broadcast %581 : vector<1x2xf32> to vector<16x2xf32>
    %583 = arith.mulf %36, %582 : vector<16x2xf32>
    %584 = vector.extract_strided_slice %535 {offsets = [1, 0], sizes = [1, 2], strides = [1, 1]} : vector<4x2xf32> to vector<1x2xf32>
    %585 = vector.broadcast %584 : vector<1x2xf32> to vector<16x2xf32>
    %586 = arith.mulf %39, %585 : vector<16x2xf32>
    %587 = vector.extract_strided_slice %535 {offsets = [2, 0], sizes = [1, 2], strides = [1, 1]} : vector<4x2xf32> to vector<1x2xf32>
    %588 = vector.broadcast %587 : vector<1x2xf32> to vector<16x2xf32>
    %589 = arith.mulf %42, %588 : vector<16x2xf32>
    %590 = vector.extract_strided_slice %535 {offsets = [3, 0], sizes = [1, 2], strides = [1, 1]} : vector<4x2xf32> to vector<1x2xf32>
    %591 = vector.broadcast %590 : vector<1x2xf32> to vector<16x2xf32>
    %592 = arith.mulf %45, %591 : vector<16x2xf32>
    %593 = arith.addf %48, %571 : vector<16x2xf32>
    %594 = arith.addf %574, %577 : vector<16x2xf32>
    %595 = arith.addf %580, %583 : vector<16x2xf32>
    %596 = arith.addf %586, %589 : vector<16x2xf32>
    %597 = arith.addf %593, %594 : vector<16x2xf32>
    %598 = arith.addf %595, %596 : vector<16x2xf32>
    %599 = arith.addf %597, %598 : vector<16x2xf32>
    %600 = arith.addf %599, %592 : vector<16x2xf32>
    %601 = vector.extract_strided_slice %600 {offsets = [0, 0], sizes = [12, 2], strides = [1, 1]} : vector<16x2xf32> to vector<12x2xf32>
    %602 = arith.negf %601 : vector<12x2xf32>
    %603 = math.exp %602 : vector<12x2xf32>
    %cst_27 = arith.constant 1.000000e+00 : f32
    %604 = vector.broadcast %cst_27 : f32 to vector<12x2xf32>
    %605 = arith.addf %604, %603 : vector<12x2xf32>
    %606 = arith.divf %604, %605 : vector<12x2xf32>
    %607 = vector.extract_strided_slice %600 {offsets = [12, 0], sizes = [4, 2], strides = [1, 1]} : vector<16x2xf32> to vector<4x2xf32>
    %608 = math.tanh %607 : vector<4x2xf32>
    %609 = vector.extract_strided_slice %606 {offsets = [0, 0], sizes = [4, 2], strides = [1, 1]} : vector<12x2xf32> to vector<4x2xf32>
    %610 = vector.extract_strided_slice %606 {offsets = [4, 0], sizes = [4, 2], strides = [1, 1]} : vector<12x2xf32> to vector<4x2xf32>
    %611 = vector.extract_strided_slice %606 {offsets = [8, 0], sizes = [4, 2], strides = [1, 1]} : vector<12x2xf32> to vector<4x2xf32>
    %612 = arith.mulf %610, %533 : vector<4x2xf32>
    %613 = arith.mulf %609, %608 : vector<4x2xf32>
    %614 = arith.addf %612, %613 : vector<4x2xf32>
    %615 = math.tanh %614 : vector<4x2xf32>
    %616 = arith.mulf %611, %615 : vector<4x2xf32>
    %617 = vector.extract_strided_slice %6 {offsets = [0, 14], sizes = [16, 2], strides = [1, 1]} : vector<16x16xf32> to vector<16x2xf32>
    %618 = vector.extract_strided_slice %568 {offsets = [0, 0], sizes = [1, 2], strides = [1, 1]} : vector<4x2xf32> to vector<1x2xf32>
    %619 = vector.broadcast %618 : vector<1x2xf32> to vector<16x2xf32>
    %620 = arith.mulf %12, %619 : vector<16x2xf32>
    %621 = vector.extract_strided_slice %568 {offsets = [1, 0], sizes = [1, 2], strides = [1, 1]} : vector<4x2xf32> to vector<1x2xf32>
    %622 = vector.broadcast %621 : vector<1x2xf32> to vector<16x2xf32>
    %623 = arith.mulf %15, %622 : vector<16x2xf32>
    %624 = vector.extract_strided_slice %568 {offsets = [2, 0], sizes = [1, 2], strides = [1, 1]} : vector<4x2xf32> to vector<1x2xf32>
    %625 = vector.broadcast %624 : vector<1x2xf32> to vector<16x2xf32>
    %626 = arith.mulf %18, %625 : vector<16x2xf32>
    %627 = vector.extract_strided_slice %568 {offsets = [3, 0], sizes = [1, 2], strides = [1, 1]} : vector<4x2xf32> to vector<1x2xf32>
    %628 = vector.broadcast %627 : vector<1x2xf32> to vector<16x2xf32>
    %629 = arith.mulf %21, %628 : vector<16x2xf32>
    %630 = arith.addf %617, %620 : vector<16x2xf32>
    %631 = arith.addf %623, %626 : vector<16x2xf32>
    %632 = arith.addf %630, %631 : vector<16x2xf32>
    %633 = arith.addf %632, %629 : vector<16x2xf32>
    %634 = vector.extract_strided_slice %633 {offsets = [0, 0], sizes = [12, 2], strides = [1, 1]} : vector<16x2xf32> to vector<12x2xf32>
    %635 = arith.negf %634 : vector<12x2xf32>
    %636 = math.exp %635 : vector<12x2xf32>
    %cst_28 = arith.constant 1.000000e+00 : f32
    %637 = vector.broadcast %cst_28 : f32 to vector<12x2xf32>
    %638 = arith.addf %637, %636 : vector<12x2xf32>
    %639 = arith.divf %637, %638 : vector<12x2xf32>
    %640 = vector.extract_strided_slice %633 {offsets = [12, 0], sizes = [4, 2], strides = [1, 1]} : vector<16x2xf32> to vector<4x2xf32>
    %641 = math.tanh %640 : vector<4x2xf32>
    %642 = vector.extract_strided_slice %639 {offsets = [0, 0], sizes = [4, 2], strides = [1, 1]} : vector<12x2xf32> to vector<4x2xf32>
    %643 = vector.extract_strided_slice %639 {offsets = [4, 0], sizes = [4, 2], strides = [1, 1]} : vector<12x2xf32> to vector<4x2xf32>
    %644 = vector.extract_strided_slice %639 {offsets = [8, 0], sizes = [4, 2], strides = [1, 1]} : vector<12x2xf32> to vector<4x2xf32>
    %645 = arith.mulf %643, %566 : vector<4x2xf32>
    %646 = arith.mulf %642, %641 : vector<4x2xf32>
    %647 = arith.addf %645, %646 : vector<4x2xf32>
    %648 = math.tanh %647 : vector<4x2xf32>
    %649 = arith.mulf %644, %648 : vector<4x2xf32>
    %650 = vector.extract_strided_slice %649 {offsets = [0, 0], sizes = [1, 2], strides = [1, 1]} : vector<4x2xf32> to vector<1x2xf32>
    %651 = vector.broadcast %650 : vector<1x2xf32> to vector<16x2xf32>
    %652 = arith.mulf %24, %651 : vector<16x2xf32>
    %653 = vector.extract_strided_slice %649 {offsets = [1, 0], sizes = [1, 2], strides = [1, 1]} : vector<4x2xf32> to vector<1x2xf32>
    %654 = vector.broadcast %653 : vector<1x2xf32> to vector<16x2xf32>
    %655 = arith.mulf %27, %654 : vector<16x2xf32>
    %656 = vector.extract_strided_slice %649 {offsets = [2, 0], sizes = [1, 2], strides = [1, 1]} : vector<4x2xf32> to vector<1x2xf32>
    %657 = vector.broadcast %656 : vector<1x2xf32> to vector<16x2xf32>
    %658 = arith.mulf %30, %657 : vector<16x2xf32>
    %659 = vector.extract_strided_slice %649 {offsets = [3, 0], sizes = [1, 2], strides = [1, 1]} : vector<4x2xf32> to vector<1x2xf32>
    %660 = vector.broadcast %659 : vector<1x2xf32> to vector<16x2xf32>
    %661 = arith.mulf %33, %660 : vector<16x2xf32>
    %662 = vector.extract_strided_slice %616 {offsets = [0, 0], sizes = [1, 2], strides = [1, 1]} : vector<4x2xf32> to vector<1x2xf32>
    %663 = vector.broadcast %662 : vector<1x2xf32> to vector<16x2xf32>
    %664 = arith.mulf %36, %663 : vector<16x2xf32>
    %665 = vector.extract_strided_slice %616 {offsets = [1, 0], sizes = [1, 2], strides = [1, 1]} : vector<4x2xf32> to vector<1x2xf32>
    %666 = vector.broadcast %665 : vector<1x2xf32> to vector<16x2xf32>
    %667 = arith.mulf %39, %666 : vector<16x2xf32>
    %668 = vector.extract_strided_slice %616 {offsets = [2, 0], sizes = [1, 2], strides = [1, 1]} : vector<4x2xf32> to vector<1x2xf32>
    %669 = vector.broadcast %668 : vector<1x2xf32> to vector<16x2xf32>
    %670 = arith.mulf %42, %669 : vector<16x2xf32>
    %671 = vector.extract_strided_slice %616 {offsets = [3, 0], sizes = [1, 2], strides = [1, 1]} : vector<4x2xf32> to vector<1x2xf32>
    %672 = vector.broadcast %671 : vector<1x2xf32> to vector<16x2xf32>
    %673 = arith.mulf %45, %672 : vector<16x2xf32>
    %674 = arith.addf %48, %652 : vector<16x2xf32>
    %675 = arith.addf %655, %658 : vector<16x2xf32>
    %676 = arith.addf %661, %664 : vector<16x2xf32>
    %677 = arith.addf %667, %670 : vector<16x2xf32>
    %678 = arith.addf %674, %675 : vector<16x2xf32>
    %679 = arith.addf %676, %677 : vector<16x2xf32>
    %680 = arith.addf %678, %679 : vector<16x2xf32>
    %681 = arith.addf %680, %673 : vector<16x2xf32>
    %682 = vector.extract_strided_slice %681 {offsets = [0, 0], sizes = [12, 2], strides = [1, 1]} : vector<16x2xf32> to vector<12x2xf32>
    %683 = arith.negf %682 : vector<12x2xf32>
    %684 = math.exp %683 : vector<12x2xf32>
    %cst_29 = arith.constant 1.000000e+00 : f32
    %685 = vector.broadcast %cst_29 : f32 to vector<12x2xf32>
    %686 = arith.addf %685, %684 : vector<12x2xf32>
    %687 = arith.divf %685, %686 : vector<12x2xf32>
    %688 = vector.extract_strided_slice %681 {offsets = [12, 0], sizes = [4, 2], strides = [1, 1]} : vector<16x2xf32> to vector<4x2xf32>
    %689 = math.tanh %688 : vector<4x2xf32>
    %690 = vector.extract_strided_slice %687 {offsets = [0, 0], sizes = [4, 2], strides = [1, 1]} : vector<12x2xf32> to vector<4x2xf32>
    %691 = vector.extract_strided_slice %687 {offsets = [4, 0], sizes = [4, 2], strides = [1, 1]} : vector<12x2xf32> to vector<4x2xf32>
    %692 = vector.extract_strided_slice %687 {offsets = [8, 0], sizes = [4, 2], strides = [1, 1]} : vector<12x2xf32> to vector<4x2xf32>
    %693 = arith.mulf %691, %614 : vector<4x2xf32>
    %694 = arith.mulf %690, %689 : vector<4x2xf32>
    %695 = arith.addf %693, %694 : vector<4x2xf32>
    %696 = math.tanh %695 : vector<4x2xf32>
    %697 = arith.mulf %692, %696 : vector<4x2xf32>
    %698 = tpu.concatenate %130, %211, %292, %373, %454, %535, %616, %697 in 1 : vector<4x2xf32>, vector<4x2xf32>, vector<4x2xf32>, vector<4x2xf32>, vector<4x2xf32>, vector<4x2xf32>, vector<4x2xf32>, vector<4x2xf32> -> vector<4x16xf32>
    %c0_30 = arith.constant 0 : index
    %c0_31 = arith.constant 0 : index
    %699 = vector.load %arg7[%c0_30, %c0_31] : memref<1x4xf32, #tpu.memory_space<vmem>>, vector<1x4xf32>
    %c0_32 = arith.constant 0 : index
    %c0_33 = arith.constant 0 : index
    %700 = vector.load %arg8[%c0_32, %c0_33] : memref<1x1xf32, #tpu.memory_space<vmem>>, vector<1x1xf32>
    %701 = vector.shape_cast %700 : vector<1x1xf32> to vector<1x1xf32>
    %702 = vector.broadcast %701 : vector<1x1xf32> to vector<1x16xf32>
    %703 = vector.extract_strided_slice %699 {offsets = [0, 0], sizes = [1, 1], strides = [1, 1]} : vector<1x4xf32> to vector<1x1xf32>
    %704 = vector.extract_strided_slice %698 {offsets = [0, 0], sizes = [1, 16], strides = [1, 1]} : vector<4x16xf32> to vector<1x16xf32>
    %705 = vector.broadcast %703 : vector<1x1xf32> to vector<1x16xf32>
    %706 = arith.mulf %705, %704 : vector<1x16xf32>
    %707 = vector.extract_strided_slice %699 {offsets = [0, 1], sizes = [1, 1], strides = [1, 1]} : vector<1x4xf32> to vector<1x1xf32>
    %708 = vector.extract_strided_slice %698 {offsets = [1, 0], sizes = [1, 16], strides = [1, 1]} : vector<4x16xf32> to vector<1x16xf32>
    %709 = vector.broadcast %707 : vector<1x1xf32> to vector<1x16xf32>
    %710 = arith.mulf %709, %708 : vector<1x16xf32>
    %711 = vector.extract_strided_slice %699 {offsets = [0, 2], sizes = [1, 1], strides = [1, 1]} : vector<1x4xf32> to vector<1x1xf32>
    %712 = vector.extract_strided_slice %698 {offsets = [2, 0], sizes = [1, 16], strides = [1, 1]} : vector<4x16xf32> to vector<1x16xf32>
    %713 = vector.broadcast %711 : vector<1x1xf32> to vector<1x16xf32>
    %714 = arith.mulf %713, %712 : vector<1x16xf32>
    %715 = vector.extract_strided_slice %699 {offsets = [0, 3], sizes = [1, 1], strides = [1, 1]} : vector<1x4xf32> to vector<1x1xf32>
    %716 = vector.extract_strided_slice %698 {offsets = [3, 0], sizes = [1, 16], strides = [1, 1]} : vector<4x16xf32> to vector<1x16xf32>
    %717 = vector.broadcast %715 : vector<1x1xf32> to vector<1x16xf32>
    %718 = arith.mulf %717, %716 : vector<1x16xf32>
    %719 = arith.addf %702, %706 : vector<1x16xf32>
    %720 = arith.addf %710, %714 : vector<1x16xf32>
    %721 = arith.addf %719, %720 : vector<1x16xf32>
    %722 = arith.addf %721, %718 : vector<1x16xf32>
    %c0_34 = arith.constant 0 : index
    %c0_35 = arith.constant 0 : index
    %723 = vector.load %arg9[%c0_34, %c0_35] : memref<1x16xf32, #tpu.memory_space<vmem>>, vector<1x16xf32>
    tpu.vector_store %arg9[%c0_34, %c0_35], %722 {strides = array<i32>} : memref<1x16xf32, #tpu.memory_space<vmem>>, vector<1x16xf32>,
    return
  }
}

</mosaic_0001>

<bundles_post_ra>
// kernel: tpu_custom_call.1
= control target key start
LH: loop header
LB: loop body
LE: loop exit
PB: predicated region body
PF: predicated region fallthrough
CT: control target
= control target key end

     0   :  { %s3182_s0 = inlined_call_operand.vmem [shape: f32[2,16], index: 0, kind: input, shape index: {}]   ;;  %s3183_s1 = inlined_call_operand.vmem [shape: f32[16,2], index: 1, kind: input, shape index: {}]   ;;  %s3184_s2 = inlined_call_operand.vmem [shape: f32[16,4], index: 2, kind: input, shape index: {}]   ;;  %s3185_s3 = inlined_call_operand.vmem [shape: f32[16,1], index: 3, kind: input, shape index: {}]   ;;  %s3186_s4 = inlined_call_operand.vmem [shape: f32[16,4], index: 4, kind: input, shape index: {}]   ;;  %s3187_s5 = inlined_call_operand.vmem [shape: f32[16,4], index: 5, kind: input, shape index: {}]   ;;  %s3188_s6 = inlined_call_operand.vmem [shape: f32[16,1], index: 6, kind: input, shape index: {}]   ;;  %s3189_s7 = inlined_call_operand.vmem [shape: f32[1,4], index: 7, kind: input, shape index: {}]   ;;  %s3190_s8 = inlined_call_operand.<no memory space> [shape: f32[1,1], index: 8, kind: input, shape index: {}]   ;;  %s3191_s9 = inlined_call_operand.hbm [shape: f32[1,16], index: 9, kind: output, shape index: {}]  }
   0x1   :  { %v14_v0 = vstv %s3190_s8 }
   0x2   :  { %15 = vst [vmem:[#allocation2] sm:$0x1] %v14_v0 }
   0x3   :  { %v37_v1 = vld [vmem:[%s3182_s0] sm:$0x3]  ;;  %vm57_vm0 = vcmask 1041408   ;;  %vm50_vm1 = vcmask 15360   ;;  %v36_v3 = vld [vmem:[%s3183_s1 + $0x8] sm:$0xff]  ;;  %v2552_v11 = vmov 1  }
   0x4   :  { %v35_v2 = vld [vmem:[%s3183_s1] sm:$0xff]  ;;  %v59_v4 = vsel %vm57_vm0, %v37_v1, 0  ;;  %v55_v6 = vsel %vm50_vm1, %v36_v3, 0  ;;  %2307 = vset.pattern.permute.xlu1 %v2552_v11 }
   0x5   :  { %v52_v5 = vsel %vm50_vm1, %v35_v2, 0  ;;  %v550_v7 = vld [vmem:[%s3184_s2] sm:$0xff]  ;;  %v62_v8 = vand.u32 4294901760, %v59_v4  ;;  %v137_v10 = vand.u32 4294901760, %v55_v6 }
   0x6   :  { %v127_v9 = vand.u32 4294901760, %v52_v5  ;;  %567 = vperm.xlu1 %2307, %v550_v7   ;;  %v38_v15 = vld [vmem:[%s3185_s3] sm:$0xff] }
   0x7   :  { %2273 = vmatprep.subr.mxu0 %v62_v8  ;;  %v138_v13 = vsub.f32 %v55_v6, %v137_v10  ;;  %2258 = vmatprep.subr.mxu1 %v62_v8  ;;  %v149_v14 = vsub.f32 %v59_v4, %v62_v8 }
   0x8   :  { %v128_v12 = vsub.f32 %v52_v5, %v127_v9  ;;  %2274 = vmatpush3.msra.mxu0 %v62_v8  ;;  %2259 = vmatpush3.msra.mxu1 %v62_v8 }
   0x9   :  { %16 = vsyncpa [#allocation4], 0  ;;  %v139_v17 = vand.u32 4294901760, %v138_v13  ;;  %v150_v18 = vand.u32 4294901760, %v149_v14  ;;  %v2553_v19 = vmov 0   ;;  %v2554_v20 = vmov 2  }
   0xa   :  { %v129_v16 = vand.u32 4294901760, %v128_v12  ;;  %2306 = vset.pattern.permute.xlu0 %v2553_v19  ;;  %2308 = vset.pattern.permute.xlu1 %v2554_v20  ;;  %v39_v27 = vld [vmem:[%s3185_s3 + $0x8] sm:$0xff]  ;;  %v2555_v29 = vmov 3   ;;  %v552_v30 = vld [vmem:[%s3186_s4] sm:$0xff]  ;;  %vm2119_vm2 = vcmask 31744   ;;  %vm2121_vm3 = vcmask 48128  }
   0xb   :  { %42 = vperm.xlu0 %2306, %v38_v15   ;;  %v151_v22 = vsub.f32 %v149_v14, %v150_v18  ;;  %v140_v23 = vsub.f32 %v138_v13, %v139_v17  ;;  %2278 = vmatprep.subr.mxu0 %v150_v18  ;;  %v551_v28 = vld [vmem:[%s3184_s2 + $0x8] sm:$0xff]  ;;  %v554_v31 = vld [vmem:[%s3187_s5] sm:$0xff]  ;;  %vm2123_vm4 = vcmask 64512   ;;  %vm2125_vm5 = vcmask 80896  }
   0xc   :  { %2275 = vmatprep.mubr.f32.mxu0 %v129_v16  ;;  %v130_v21 = vsub.f32 %v128_v12, %v129_v16  ;;  %575 = vperm.xlu1 %2308, %v550_v7   ;;  %v553_v32 = vld [vmem:[%s3186_s4 + $0x8] sm:$0xff]  ;;  %v658_v33 = vld [vmem:[%s3188_s6] sm:$0xff]  ;;  %vm2127_vm6 = vcmask 97280   ;;  %vm2129_vm7 = vcmask 113664   ;;  %vm2192_vm8 = vcmask 122880  }
   0xd   :  { %2276 = vmatmul.mubr.f32.vlgmr.msra.gmra.mrb[0].mxu0 %v139_v17  ;;  %v152_v25 = vand.u32 4294901760, %v151_v22  ;;  %v141_v26 = vand.u32 4294901760, %v140_v23  ;;  %v555_v34 = vld [vmem:[%s3187_s5 + $0x8] sm:$0xff] }
   0xe   :  { %v131_v24 = vand.u32 4294901760, %v130_v21  ;;  %2279 = vmatpush3.msra.mxu0 %v150_v18  ;;  %2280 = vmatprep.mubr.f32.mxu0 %v127_v9  ;;  %v659_v35 = vld [vmem:[%s3188_s6 + $0x8] sm:$0xff]  ;;  %s2556_s6 = smov 2  }
   0xf   :  { %2283 = vmatprep.subr.mxu0 %v62_v8  ;;  %558 = vperm.xlu0 %2306, %v550_v7  }
  0x10   :  { %2260 = vmatprep.mubr.f32.mxu1 %v131_v24  ;;  %2263 = vmatprep.subr.mxu1 %v152_v25 }
  0x11   :  { %2261 = vmatmul.mubr.f32.vlgmr.msra.gmra.mrb[0].mxu1 %v141_v26  ;;  %2310 = vset.pattern.permute.xlu1 %v2553_v19 }
  0x12   :  { %2264 = vmatpush3.msra.mxu1 %v152_v25  ;;  %2265 = vmatprep.mubr.f32.mxu1 %v127_v9 }
  0x13   :  { %2268 = vmatprep.subr.mxu1 %v149_v14  ;;  %47 = vperm.xlu1 %2310, %v39_v27  }
  0x14   :  { %2309 = vset.pattern.permute.xlu0 %v2555_v29 }
  0x15   :  { %2281 = vmatmul.mubr.f32.vlgmr.msra.gmra.mrb[0].mxu0 %v137_v10  ;;  %583 = vperm.xlu0 %2309, %v550_v7  }
  0x16   :  { %2284 = vmatpush3.msra.mxu0 %v62_v8  ;;  %2285 = vmatprep.mubr.f32.mxu0 %v127_v9 }
  0x17   :  { %563 = vperm.xlu1 %2310, %v551_v28  }
  0x19   :  { %2266 = vmatmul.mubr.f32.vlgmr.msra.gmra.mrb[0].mxu1 %v137_v10  ;;  %2311 = vset.pattern.permute.xlu0 %v2552_v11 }
  0x1a   :  { %2269 = vmatpush3.msra.mxu1 %v149_v14  ;;  %2270 = vmatprep.mubr.f32.mxu1 %v128_v12 }
  0x1b   :  { %2312 = vset.pattern.permute.xlu1 %v2554_v20  ;;  %571 = vperm.xlu0 %2311, %v551_v28  }
  0x1c   :  { %579 = vperm.xlu1 %2312, %v551_v28  }
  0x1d   :  { %2286 = vmatmul.mubr.f32.vlgmr.msra.gmra.mrb[0].mxu0 %v137_v10 }
  0x1f   :  { %2316 = vset.pattern.permute.xlu0 %v2555_v29 }
  0x20   :  { %2313 = vset.pattern.permute.xlu1 %v2555_v29  ;;  %617 = vperm.xlu0 %2316, %v552_v30  }
  0x21   :  { %2271 = vmatmul.mubr.f32.vlgmr.msra.gmra.mrb[0].mxu1 %v138_v13  ;;  %587 = vperm.xlu1 %2313, %v551_v28  }
  0x24   :  { %2319 = vset.pattern.permute.xlu0 %v2554_v20 }
  0x25   :  { %2314 = vset.pattern.permute.xlu1 %v2552_v11  ;;  %643 = vperm.xlu0 %2319, %v554_v31  }
  0x26   :  { %601 = vperm.xlu1 %2314, %v552_v30  }
  0x29   :  { %2320 = vset.pattern.permute.xlu0 %v2553_v19 }
  0x2a   :  { %2315 = vset.pattern.permute.xlu1 %v2554_v20  ;;  %592 = vperm.xlu0 %2320, %v552_v30  }
  0x2b   :  { %609 = vperm.xlu1 %2315, %v552_v30  }
  0x2e   :  { %597 = vperm.xlu0 %2320, %v553_v32  }
  0x2f   :  { %2317 = vset.pattern.permute.xlu1 %v2553_v19 }
  0x30   :  { %626 = vperm.xlu1 %2317, %v554_v31  }
  0x32   :  { %2325 = vset.pattern.permute.xlu0 %v2555_v29 }
  0x33   :  { %621 = vperm.xlu0 %2325, %v553_v32  }
  0x34   :  { %2318 = vset.pattern.permute.xlu1 %v2552_v11 }
  0x35   :  { %635 = vperm.xlu1 %2318, %v554_v31  }
  0x37   :  { %2328 = vset.pattern.permute.xlu0 %v2554_v20 }
  0x38   :  { %647 = vperm.xlu0 %2328, %v555_v34  }
  0x39   :  { %2321 = vset.pattern.permute.xlu1 %v2553_v19 }
  0x3a   :  { %662 = vperm.xlu1 %2321, %v658_v33  }
  0x3e   :  { %2322 = vset.pattern.permute.xlu1 %v2555_v29 }
  0x3f   :  { %651 = vperm.xlu1 %2322, %v554_v31  }
  0x43   :  { %2323 = vset.pattern.permute.xlu1 %v2552_v11 }
  0x44   :  { %605 = vperm.xlu1 %2323, %v553_v32  }
  0x48   :  { %2324 = vset.pattern.permute.xlu1 %v2554_v20 }
  0x49   :  { %613 = vperm.xlu1 %2324, %v553_v32   ;;  %v713_v32 = vlaneseq }
  0x4d   :  { %2326 = vset.pattern.permute.xlu1 %v2553_v19 }
  0x4e   :  { %631 = vperm.xlu1 %2326, %v555_v34  }
  0x52   :  { %2327 = vset.pattern.permute.xlu1 %v2552_v11 }
  0x53   :  { %639 = vperm.xlu1 %2327, %v555_v34  }
  0x57   :  { %2329 = vset.pattern.permute.xlu1 %v2553_v19 }
  0x58   :  { %667 = vperm.xlu1 %2329, %v659_v35  }
  0x5c   :  { %2330 = vset.pattern.permute.xlu1 %v2555_v29 }
  0x5d   :  { %655 = vperm.xlu1 %2330, %v555_v34   ;;  %v714_v34 = vshrl.u32 %v713_v32, 7 }
  0x61   :  { %2331 = vset.pattern.permute.xlu1 %v2552_v11 }
  0x85   :  { %v2678_v36 = vpop.permute.xlu1 %567 }
  0x86   :  { %v672_v50 = vmul.f32 0.0, %v2678_v36 }
  0x8a   :  { %v43_v39 = vpop.permute.xlu0 %42 }
  0x8b   :  { %v2680_v37 = vpop.permute.xlu1 %575 }
  0x8c   :  { %v674_v51 = vmul.f32 0.0, %v2680_v37 }
  0x8e   :  { %v2684_v41 = vpop.permute.xlu0 %558  ;;  %v680_v58 = vadd.f32 %v674_v51, %v672_v50 }
  0x8f   :  { %v670_v54 = vmul.f32 0.0, %v2684_v41 }
  0x92   :  { %v48_v38 = vpop.permute.xlu1 %47 }
  0x94   :  { %v2688_v45 = vpop.permute.xlu0 %583 }
  0x95   :  { %v676_v59 = vmul.f32 0.0, %v2688_v45 }
  0x96   :  { %v2682_v40 = vpop.permute.xlu1 %563 }
  0x97   :  { %v671_v61 = vmul.f32 0.0, %v2682_v40 }
  0x9a   :  { %v2699_v56 = vpop.permute.xlu0 %571 }
  0x9b   :  { %v2686_v42 = vpop.permute.xlu1 %579  ;;  %v673_v63 = vmul.f32 0.0, %v2699_v56 }
  0x9c   :  { %v675_v62 = vmul.f32 0.0, %v2686_v42 }
  0x9e   :  { %v681_v2 = vadd.f32 %v675_v62, %v673_v63 }
  0x9f   :  { %v2716_v14 = vpop.permute.xlu0 %617 }
  0xa0   :  { %v2690_v49 = vpop.permute.xlu1 %587 }
  0xa1   :  { %v677_v6 = vmul.f32 0.0, %v2690_v49 }
  0xa4   :  { %v2720_v17 = vpop.permute.xlu0 %643 }
  0xa5   :  { %v2701_v57 = vpop.permute.xlu1 %601  ;;  %v741_v63 = vmul.f32 0.0, %v2720_v17 }
  0xa9   :  { %v2724_v24 = vpop.permute.xlu0 %592 }
  0xaa   :  { %v2709_v4 = vpop.permute.xlu1 %609 }
  0xad   :  { %v2731_v31 = vpop.permute.xlu0 %597 }
  0xaf   :  { %v2712_v8 = vpop.permute.xlu1 %626 }
  0xb2   :  { %v2735_v35 = vpop.permute.xlu0 %621 }
  0xb4   :  { %v2714_v10 = vpop.permute.xlu1 %635 }
  0xb5   :  { %v739_v62 = vmul.f32 0.0, %v2714_v10 }
  0xb7   :  { %v2747_v51 = vpop.permute.xlu0 %647 }
  0xb9   :  { %v2718_v15 = vpop.permute.xlu1 %662 }
  0xbe   :  { %v2722_v18 = vpop.permute.xlu1 %651 }
  0xc3   :  { %v2726_v27 = vpop.permute.xlu1 %605 }
  0xc8   :  { %v2733_v33 = vpop.permute.xlu1 %613 }
  0xf0   :  { %v2287_v43 = vpop.f32.mrb[0].mxu0 }
  0xf1   :  { %v540_v44 = vpop.f32.mrb[1].mxu0 }
  0xf4   :  { %v2272_v46 = vpop.f32.mrb[0].mxu1 }
  0xf5   :  { %v2288_v47 = vadd.f32 %v2272_v46, %v48_v38  ;;  %v299_v48 = vpop.f32.mrb[1].mxu1  ;;  %v2737_v38 = vpop.permute.xlu1 %631  ;;  %v2741_v46 = vsub.s32 1, %v714_v34 }
  0xf6   :  { %v2290_v52 = vadd.f32 %v299_v48, %v43_v39  ;;  %v2745_v48 = vsub.s32 3, %v714_v34 }
  0xf7   :  { %v2694_v53 = vadd.f32 %v2288_v47, %v2287_v43  ;;  %v2739_v43 = vsub.s32 0, %v714_v34  ;;  %v2743_v47 = vsub.s32 2, %v714_v34  ;;  %v751_v34 = vadd.f32 %v741_v63, %v739_v62 }
  0xf8   :  { %v2697_v55 = vadd.f32 %v2290_v52, %v540_v44  ;;  %v743_v62 = vmul.f32 0.0, %v2722_v18 }
  0xf9   :  { %v679_v3 = vadd.f32 %v2694_v53, %v671_v61 }
  0xfa   :  { %v678_v60 = vadd.f32 %v2697_v55, %v670_v54  ;;  %v2749_v54 = vpop.permute.xlu1 %639 }
  0xfb   :  { %v683_v7 = vadd.f32 %v681_v2, %v679_v3 }
  0xfc   :  { %v682_v0 = vadd.f32 %v680_v58, %v678_v60 }
  0xfd   :  { %v685_v9 = vadd.f32 %v683_v7, %v677_v6  ;;  %v738_v6 = vmul.f32 0.0, %v2737_v38  ;;  %v740_v7 = vmul.f32 0.0, %v2749_v54 }
  0xfe   :  { %v684_v1 = vadd.f32 %v682_v0, %v676_v59  ;;  %v742_v0 = vmul.f32 0.0, %v2747_v51 }
  0xff   :  { %v2209_v12 = vmul.f32 -1.442695, %v685_v9 }
 0x100   :  { %v2208_v5 = vmul.f32 -1.442695, %v684_v1  ;;  %v737_v1 = vmul.f32 0.0, %v2712_v8 }
 0x102   :  { %2336 = vpow2.f32 %v2208_v5 }
 0x103   :  { %2338 = vtanh.f32 %v685_v9 }
 0x10c   :  { %v2337_v11 = vpop.eup %2336 }
 0x10d   :  { %v692_v13 = vadd.f32 1.0, %v2337_v11  ;;  %v2339_v16 = vpop.eup %2338 }
 0x10e   :  { %v701_v20 = vrot.slane %v2339_v16, 4 }
 0x10f   :  { %2340 = vrcp.f32 %v692_v13 }
 0x110   :  { %2342 = vpow2.f32 %v2209_v12 }
 0x119   :  { %v2341_v21 = vpop.eup %2340 }
 0x11a   :  { %v703_v22 = vmul.f32 %v2341_v21, %v701_v20  ;;  %v2343_v23 = vpop.eup %2342  ;;  %v699_v25 = vmul.f32 0.0, %v2341_v21 }
 0x11b   :  { %v693_v28 = vadd.f32 1.0, %v2343_v23 }
 0x11c   :  { %v705_v26 = vrot.slane %v703_v22, 4 }
 0x11e   :  { %v2728_v30 = vadd.f32 %v705_v26, %v699_v25 }
 0x120   :  { %2344 = vtanh.f32 %v2728_v30 }
 0x121   :  { %2346 = vrcp.f32 %v693_v28  ;;  %v2774_v28 = vpop.permute.xlu1 %667 }
 0x12a   :  { %v2345_v39 = vpop.eup %2344 }
 0x12b   :  { %v710_v44 = vrot.slane %v2345_v39, 4  ;;  %v2347_v50 = vpop.eup %2346 }
 0x12d   :  { %v712_v52 = vmul.f32 %v2347_v50, %v710_v44 }
 0x12f   :  { %v716_v58 = vrot.slane %v712_v52, %v2739_v43  ;;  %v722_v59 = vrot.slane %v712_v52, %v2741_v46  ;;  %v728_v60 = vrot.slane %v712_v52, %v2743_v47  ;;  %v734_v61 = vrot.slane %v712_v52, %v2745_v48 }
 0x131   :  { %v788_v2 = vmul.f32 %v716_v58, %v2684_v41  ;;  %v717_v3 = vmul.f32 %v716_v58, %v2724_v24  ;;  %v729_v5 = vmul.f32 %v728_v60, %v2709_v4  ;;  %v790_v9 = vmul.f32 %v722_v59, %v2678_v36 }
 0x132   :  { %v792_v11 = vmul.f32 %v728_v60, %v2680_v37  ;;  %v723_v12 = vmul.f32 %v722_v59, %v2701_v57  ;;  %v718_v13 = vmul.f32 %v716_v58, %v2731_v31  ;;  %v730_v20 = vmul.f32 %v728_v60, %v2733_v33 }
 0x133   :  { %798 = vrot.lane.b32.xlu0 %v788_v2, %s2556_s6  ;;  %v745_v16 = vadd.f32 %v717_v3, %v2718_v15  ;;  %v735_v21 = vmul.f32 %v734_v61, %v2716_v14  ;;  %v724_v23 = vmul.f32 %v722_v59, %v2726_v27  ;;  %v736_v26 = vmul.f32 %v734_v61, %v2735_v35 }
 0x134   :  { %v806_v22 = vadd.f32 %v792_v11, %v790_v9  ;;  %v747_v25 = vadd.f32 %v729_v5, %v723_v12  ;;  %v794_v39 = vmul.f32 %v734_v61, %v2688_v45  ;;  %v791_v44 = vmul.f32 %v722_v59, %v2699_v56 }
 0x135   :  { %v749_v32 = vadd.f32 %v737_v1, %v735_v21  ;;  %v793_v52 = vmul.f32 %v728_v60, %v2686_v42  ;;  %v752_v2 = vadd.f32 %v742_v0, %v740_v7  ;;  %v746_v5 = vadd.f32 %v718_v13, %v2774_v28 }
 0x136   :  { %810 = vrot.lane.b32.xlu1 %v806_v22, %s2556_s6  ;;  %v753_v50 = vadd.f32 %v747_v25, %v745_v16  ;;  %v748_v9 = vadd.f32 %v730_v20, %v724_v23  ;;  %v750_v11 = vadd.f32 %v738_v6, %v736_v26  ;;  %v789_v1 = vmul.f32 %v716_v58, %v2682_v40  ;;  %v2787_v16 = vpop.permute.xlu1 %655 }
 0x137   :  { %v755_v3 = vadd.f32 %v751_v34, %v749_v32  ;;  %820 = vrot.lane.b32.xlu0 %v794_v39, %s2556_s6  ;;  %v807_v12 = vadd.f32 %v793_v52, %v791_v44  ;;  %v795_v7 = vmul.f32 %v734_v61, %v2690_v49  ;;  %v744_v58 = vmul.f32 0.0, %v2787_v16 }
 0x138   :  { %v754_v60 = vadd.f32 %v748_v9, %v746_v5  ;;  %v756_v0 = vadd.f32 %v752_v2, %v750_v11 }
 0x139   :  { %v757_v63 = vadd.f32 %v755_v3, %v753_v50 }
 0x13a   :  { %800 = vrot.lane.b32.xlu1 %v789_v1, %s2556_s6  ;;  %v758_v6 = vadd.f32 %v756_v0, %v754_v60 }
 0x13b   :  { %v759_v59 = vadd.f32 %v757_v63, %v743_v62  ;;  %812 = vrot.lane.b32.xlu0 %v807_v12, %s2556_s6 }
 0x13c   :  { %v760_v20 = vadd.f32 %v758_v6, %v744_v58 }
 0x13d   :  { %v2210_v13 = vmul.f32 -1.442695, %v759_v59 }
 0x13e   :  { %822 = vrot.lane.b32.xlu1 %v795_v7, %s2556_s6  ;;  %v2211_v22 = vmul.f32 -1.442695, %v760_v20 }
 0x13f   :  { %2348 = vpow2.f32 %v2210_v13  ;;  %842 = vrot.lane.b32.xlu0 %v2728_v30, %s2556_s6 }
 0x140   :  { %2350 = vtanh.f32 %v760_v20 }
 0x149   :  { %v2349_v21 = vpop.eup %2348 }
 0x14a   :  { %v767_v23 = vadd.f32 1.0, %v2349_v21  ;;  %v2351_v61 = vpop.eup %2350 }
 0x14b   :  { %v776_v25 = vrot.slane %v2351_v61, 4 }
 0x14c   :  { %2352 = vrcp.f32 %v767_v23 }
 0x14d   :  { %2354 = vpow2.f32 %v2211_v22 }
 0x156   :  { %v2353_v26 = vpop.eup %2352 }
 0x157   :  { %v778_v32 = vmul.f32 %v2353_v26, %v776_v25  ;;  %v2355_v34 = vpop.eup %2354  ;;  %v774_v39 = vmul.f32 0.0, %v2353_v26 }
 0x158   :  { %v768_v50 = vadd.f32 1.0, %v2355_v34 }
 0x159   :  { %v780_v44 = vrot.slane %v778_v32, 4 }
 0x15b   :  { %v782_v52 = vadd.f32 %v780_v44, %v774_v39 }
 0x15d   :  { %2356 = vtanh.f32 %v782_v52 }
 0x15e   :  { %2358 = vrcp.f32 %v768_v50 }
 0x167   :  { %v2357_v30 = vpop.eup %2356 }
 0x168   :  { %v785_v2 = vrot.slane %v2357_v30, 4  ;;  %v2359_v3 = vpop.eup %2358 }
 0x16a   :  { %v2793_v5 = vmul.f32 %v2359_v3, %v785_v2 }
 0x16c   :  { %v886_v9 = vrot.slane %v2793_v5, %v2739_v43  ;;  %v892_v11 = vrot.slane %v2793_v5, %v2741_v46  ;;  %v898_v1 = vrot.slane %v2793_v5, %v2743_v47  ;;  %v904_v59 = vrot.slane %v2793_v5, %v2745_v48 }
 0x16e   :  { %v887_v62 = vmul.f32 %v886_v9, %v2712_v8  ;;  %v893_v63 = vmul.f32 %v892_v11, %v2714_v10  ;;  %v899_v12 = vmul.f32 %v898_v1, %v2720_v17  ;;  %v905_v0 = vmul.f32 %v904_v59, %v2722_v18 }
 0x16f   :  { %v894_v7 = vmul.f32 %v892_v11, %v2749_v54  ;;  %v900_v13 = vmul.f32 %v898_v1, %v2747_v51  ;;  %v888_v58 = vmul.f32 %v886_v9, %v2737_v38  ;;  %v906_v20 = vmul.f32 %v904_v59, %v2787_v16 }
 0x170   :  { %913 = vrot.lane.b32.xlu1 %v887_v62, %s2556_s6  ;;  %v921_v60 = vadd.f32 %v899_v12, %v893_v63 }
 0x171   :  { %v922_v6 = vadd.f32 %v900_v13, %v894_v7 }
 0x172   :  { %927 = vrot.lane.b32.xlu0 %v921_v60, %s2556_s6 }
 0x174   :  { %939 = vrot.lane.b32.xlu1 %v905_v0, %s2556_s6 }
 0x176   :  { %915 = vrot.lane.b32.xlu0 %v888_v58, %s2556_s6 }
 0x178   :  { %929 = vrot.lane.b32.xlu1 %v922_v6, %s2556_s6 }
 0x17a   :  { %941 = vrot.lane.b32.xlu0 %v906_v20, %s2556_s6 }
 0x17c   :  { %961 = vrot.lane.b32.xlu1 %v782_v52, %s2556_s6 }
 0x1a5   :  { %v799_v21 = vpop.permute.xlu0 %798 }
 0x1a6   :  { %v804_v22 = vadd.f32 %v2697_v55, %v799_v21 }
 0x1a8   :  { %v811_v23 = vpop.permute.xlu1 %810 }
 0x1a9   :  { %v816_v61 = vadd.f32 %v811_v23, %v804_v22  ;;  %v821_v25 = vpop.permute.xlu0 %820 }
 0x1ab   :  { %v826_v26 = vadd.f32 %v821_v25, %v816_v61 }
 0x1ac   :  { %v801_v32 = vpop.permute.xlu1 %800 }
 0x1ad   :  { %v2212_v34 = vmul.f32 -1.442695, %v826_v26  ;;  %v805_v39 = vadd.f32 %v2694_v53, %v801_v32  ;;  %v813_v44 = vpop.permute.xlu0 %812 }
 0x1af   :  { %2360 = vpow2.f32 %v2212_v34  ;;  %v817_v50 = vadd.f32 %v813_v44, %v805_v39 }
 0x1b0   :  { %v823_v30 = vpop.permute.xlu1 %822 }
 0x1b1   :  { %v827_v2 = vadd.f32 %v823_v30, %v817_v50  ;;  %v843_v59 = vpop.permute.xlu0 %842 }
 0x1b3   :  { %2362 = vtanh.f32 %v827_v2  ;;  %v2213_v52 = vmul.f32 -1.442695, %v827_v2 }
 0x1b9   :  { %v2361_v3 = vpop.eup %2360 }
 0x1ba   :  { %v834_v9 = vadd.f32 1.0, %v2361_v3 }
 0x1bc   :  { %2364 = vrcp.f32 %v834_v9 }
 0x1bd   :  { %2366 = vpow2.f32 %v2213_v52  ;;  %v2363_v11 = vpop.eup %2362 }
 0x1be   :  { %v847_v1 = vrot.slane %v2363_v11, 4 }
 0x1c6   :  { %v2365_v62 = vpop.eup %2364 }
 0x1c7   :  { %v849_v63 = vmul.f32 %v2365_v62, %v847_v1  ;;  %v2367_v12 = vpop.eup %2366  ;;  %v845_v0 = vmul.f32 %v2365_v62, %v843_v59 }
 0x1c8   :  { %v835_v7 = vadd.f32 1.0, %v2367_v12 }
 0x1c9   :  { %v851_v60 = vrot.slane %v849_v63, 4 }
 0x1cb   :  { %v853_v13 = vadd.f32 %v851_v60, %v845_v0 }
 0x1cd   :  { %2368 = vtanh.f32 %v853_v13 }
 0x1ce   :  { %2370 = vrcp.f32 %v835_v7 }
 0x1d7   :  { %v2369_v58 = vpop.eup %2368 }
 0x1d8   :  { %v856_v6 = vrot.slane %v2369_v58, 4  ;;  %v2371_v20 = vpop.eup %2370 }
 0x1da   :  { %v858_v21 = vmul.f32 %v2371_v20, %v856_v6 }
 0x1dc   :  { %v862_v22 = vrot.slane %v858_v21, %v2739_v43  ;;  %v868_v23 = vrot.slane %v858_v21, %v2741_v46  ;;  %v874_v61 = vrot.slane %v858_v21, %v2743_v47  ;;  %v880_v25 = vrot.slane %v858_v21, %v2745_v48 }
 0x1de   :  { %v978_v26 = vmul.f32 %v862_v22, %v2684_v41  ;;  %v980_v32 = vmul.f32 %v868_v23, %v2678_v36  ;;  %v982_v34 = vmul.f32 %v874_v61, %v2680_v37  ;;  %v863_v39 = vmul.f32 %v862_v22, %v2724_v24 }
 0x1df   :  { %v869_v44 = vmul.f32 %v868_v23, %v2701_v57  ;;  %v875_v50 = vmul.f32 %v874_v61, %v2709_v4  ;;  %v881_v2 = vmul.f32 %v880_v25, %v2716_v14  ;;  %v984_v11 = vmul.f32 %v880_v25, %v2688_v45 }
 0x1e0   :  { %988 = vrot.lane.b32.xlu0 %v978_v26, %s2556_s6  ;;  %v996_v30 = vadd.f32 %v982_v34, %v980_v32  ;;  %v907_v3 = vadd.f32 %v863_v39, %v2718_v15  ;;  %v981_v1 = vmul.f32 %v868_v23, %v2699_v56  ;;  %v983_v62 = vmul.f32 %v874_v61, %v2686_v42 }
 0x1e1   :  { %v909_v9 = vadd.f32 %v875_v50, %v869_v44  ;;  %v979_v59 = vmul.f32 %v862_v22, %v2682_v40  ;;  %v864_v60 = vmul.f32 %v862_v22, %v2731_v31  ;;  %v870_v0 = vmul.f32 %v868_v23, %v2726_v27 }
 0x1e2   :  { %v914_v52 = vpop.permute.xlu1 %913  ;;  %1000 = vrot.lane.b32.xlu1 %v996_v30, %s2556_s6  ;;  %v876_v7 = vmul.f32 %v874_v61, %v2733_v33  ;;  %v997_v21 = vadd.f32 %v983_v62, %v981_v1  ;;  %v882_v32 = vmul.f32 %v880_v25, %v2735_v35  ;;  %v985_v39 = vmul.f32 %v880_v25, %v2690_v49 }
 0x1e3   :  { %v919_v63 = vadd.f32 %v914_v52, %v881_v2  ;;  %v923_v6 = vadd.f32 %v909_v9, %v907_v3  ;;  %v908_v22 = vadd.f32 %v864_v60, %v2774_v28 }
 0x1e4   :  { %v928_v12 = vpop.permute.xlu0 %927  ;;  %1010 = vrot.lane.b32.xlu0 %v984_v11, %s2556_s6  ;;  %v910_v44 = vadd.f32 %v876_v7, %v870_v0 }
 0x1e5   :  { %v933_v58 = vadd.f32 %v928_v12, %v919_v63 }
 0x1e6   :  { %v940_v20 = vpop.permute.xlu1 %939  ;;  %990 = vrot.lane.b32.xlu1 %v979_v59, %s2556_s6  ;;  %v924_v3 = vadd.f32 %v910_v44, %v908_v22 }
 0x1e7   :  { %v935_v26 = vadd.f32 %v933_v58, %v923_v6 }
 0x1e8   :  { %v916_v34 = vpop.permute.xlu0 %915  ;;  %1002 = vrot.lane.b32.xlu0 %v997_v21, %s2556_s6 }
 0x1e9   :  { %v945_v23 = vadd.f32 %v940_v20, %v935_v26  ;;  %v920_v50 = vadd.f32 %v916_v34, %v882_v32 }
 0x1ea   :  { %v930_v61 = vpop.permute.xlu1 %929  ;;  %1012 = vrot.lane.b32.xlu1 %v985_v39, %s2556_s6 }
 0x1eb   :  { %v2214_v30 = vmul.f32 -1.442695, %v945_v23  ;;  %v934_v2 = vadd.f32 %v930_v61, %v920_v50 }
 0x1ec   :  { %1032 = vrot.lane.b32.xlu0 %v853_v13, %s2556_s6  ;;  %v942_v52 = vpop.permute.xlu0 %941 }
 0x1ed   :  { %2372 = vpow2.f32 %v2214_v30  ;;  %v936_v9 = vadd.f32 %v934_v2, %v924_v3 }
 0x1ee   :  { %v962_v7 = vpop.permute.xlu1 %961 }
 0x1ef   :  { %v946_v11 = vadd.f32 %v942_v52, %v936_v9 }
 0x1f1   :  { %2374 = vtanh.f32 %v946_v11  ;;  %v2215_v62 = vmul.f32 -1.442695, %v946_v11 }
 0x1f7   :  { %v2373_v1 = vpop.eup %2372 }
 0x1f8   :  { %v953_v25 = vadd.f32 1.0, %v2373_v1 }
 0x1fa   :  { %2376 = vrcp.f32 %v953_v25 }
 0x1fb   :  { %2378 = vpow2.f32 %v2215_v62  ;;  %v2375_v63 = vpop.eup %2374 }
 0x1fc   :  { %v966_v12 = vrot.slane %v2375_v63, 4 }
 0x204   :  { %v2377_v59 = vpop.eup %2376 }
 0x205   :  { %v968_v60 = vmul.f32 %v2377_v59, %v966_v12  ;;  %v2379_v0 = vpop.eup %2378  ;;  %v964_v6 = vmul.f32 %v2377_v59, %v962_v7 }
 0x206   :  { %v954_v20 = vadd.f32 1.0, %v2379_v0 }
 0x207   :  { %v970_v58 = vrot.slane %v968_v60, 4 }
 0x209   :  { %v972_v13 = vadd.f32 %v970_v58, %v964_v6 }
 0x20b   :  { %2380 = vtanh.f32 %v972_v13 }
 0x20c   :  { %2382 = vrcp.f32 %v954_v20 }
 0x215   :  { %v2381_v21 = vpop.eup %2380 }
 0x216   :  { %v975_v26 = vrot.slane %v2381_v21, 4  ;;  %v2383_v32 = vpop.eup %2382 }
 0x218   :  { %v2849_v34 = vmul.f32 %v2383_v32, %v975_v26 }
 0x21a   :  { %v1076_v39 = vrot.slane %v2849_v34, %v2739_v43  ;;  %v1082_v22 = vrot.slane %v2849_v34, %v2741_v46  ;;  %v1088_v44 = vrot.slane %v2849_v34, %v2743_v47  ;;  %v1094_v30 = vrot.slane %v2849_v34, %v2745_v48 }
 0x21c   :  { %v1077_v23 = vmul.f32 %v1076_v39, %v2712_v8  ;;  %v1083_v50 = vmul.f32 %v1082_v22, %v2714_v10  ;;  %v1089_v61 = vmul.f32 %v1088_v44, %v2720_v17  ;;  %v1095_v3 = vmul.f32 %v1094_v30, %v2722_v18 }
 0x21d   :  { %v1084_v9 = vmul.f32 %v1082_v22, %v2749_v54  ;;  %v1090_v52 = vmul.f32 %v1088_v44, %v2747_v51  ;;  %v1078_v11 = vmul.f32 %v1076_v39, %v2737_v38  ;;  %v1096_v25 = vmul.f32 %v1094_v30, %v2787_v16 }
 0x21e   :  { %1103 = vrot.lane.b32.xlu1 %v1077_v23, %s2556_s6  ;;  %v1111_v2 = vadd.f32 %v1089_v61, %v1083_v50 }
 0x21f   :  { %v1112_v1 = vadd.f32 %v1090_v52, %v1084_v9 }
 0x220   :  { %1117 = vrot.lane.b32.xlu0 %v1111_v2, %s2556_s6 }
 0x222   :  { %1129 = vrot.lane.b32.xlu1 %v1095_v3, %s2556_s6 }
 0x224   :  { %1105 = vrot.lane.b32.xlu0 %v1078_v11, %s2556_s6 }
 0x226   :  { %1119 = vrot.lane.b32.xlu1 %v1112_v1, %s2556_s6 }
 0x228   :  { %1131 = vrot.lane.b32.xlu0 %v1096_v25, %s2556_s6 }
 0x22a   :  { %1151 = vrot.lane.b32.xlu1 %v972_v13, %s2556_s6 }
 0x252   :  { %v989_v62 = vpop.permute.xlu0 %988 }
 0x253   :  { %v994_v63 = vadd.f32 %v2697_v55, %v989_v62 }
 0x254   :  { %v1001_v12 = vpop.permute.xlu1 %1000 }
 0x255   :  { %v1006_v59 = vadd.f32 %v1001_v12, %v994_v63 }
 0x256   :  { %v1011_v60 = vpop.permute.xlu0 %1010 }
 0x257   :  { %v1016_v0 = vadd.f32 %v1011_v60, %v1006_v59 }
 0x258   :  { %v991_v7 = vpop.permute.xlu1 %990 }
 0x259   :  { %v2216_v58 = vmul.f32 -1.442695, %v1016_v0  ;;  %v995_v6 = vadd.f32 %v2694_v53, %v991_v7 }
 0x25a   :  { %v1003_v20 = vpop.permute.xlu0 %1002 }
 0x25b   :  { %2384 = vpow2.f32 %v2216_v58  ;;  %v1007_v21 = vadd.f32 %v1003_v20, %v995_v6 }
 0x25c   :  { %v1013_v26 = vpop.permute.xlu1 %1012 }
 0x25d   :  { %v1017_v32 = vadd.f32 %v1013_v26, %v1007_v21 }
 0x25e   :  { %v1033_v2 = vpop.permute.xlu0 %1032 }
 0x25f   :  { %2386 = vtanh.f32 %v1017_v32  ;;  %v2217_v13 = vmul.f32 -1.442695, %v1017_v32 }
 0x265   :  { %v2385_v39 = vpop.eup %2384 }
 0x266   :  { %v1024_v22 = vadd.f32 1.0, %v2385_v39 }
 0x268   :  { %2388 = vrcp.f32 %v1024_v22 }
 0x269   :  { %2390 = vpow2.f32 %v2217_v13  ;;  %v2387_v44 = vpop.eup %2386 }
 0x26a   :  { %v1037_v23 = vrot.slane %v2387_v44, 4 }
 0x272   :  { %v2389_v50 = vpop.eup %2388 }
 0x273   :  { %v1039_v61 = vmul.f32 %v2389_v50, %v1037_v23  ;;  %v2391_v30 = vpop.eup %2390  ;;  %v1035_v3 = vmul.f32 %v2389_v50, %v1033_v2 }
 0x274   :  { %v1025_v52 = vadd.f32 1.0, %v2391_v30 }
 0x275   :  { %v1041_v9 = vrot.slane %v1039_v61, 4 }
 0x277   :  { %v1043_v11 = vadd.f32 %v1041_v9, %v1035_v3 }
 0x279   :  { %2392 = vtanh.f32 %v1043_v11 }
 0x27a   :  { %2394 = vrcp.f32 %v1025_v52 }
 0x283   :  { %v2393_v1 = vpop.eup %2392 }
 0x284   :  { %v1046_v25 = vrot.slane %v2393_v1, 4  ;;  %v2395_v62 = vpop.eup %2394 }
 0x286   :  { %v1048_v63 = vmul.f32 %v2395_v62, %v1046_v25 }
 0x288   :  { %v1052_v12 = vrot.slane %v1048_v63, %v2739_v43  ;;  %v1058_v59 = vrot.slane %v1048_v63, %v2741_v46  ;;  %v1064_v60 = vrot.slane %v1048_v63, %v2743_v47  ;;  %v1070_v6 = vrot.slane %v1048_v63, %v2745_v48 }
 0x28a   :  { %v1168_v0 = vmul.f32 %v1052_v12, %v2684_v41  ;;  %v1170_v7 = vmul.f32 %v1058_v59, %v2678_v36  ;;  %v1172_v58 = vmul.f32 %v1064_v60, %v2680_v37  ;;  %v1053_v20 = vmul.f32 %v1052_v12, %v2724_v24 }
 0x28b   :  { %v1059_v21 = vmul.f32 %v1058_v59, %v2701_v57  ;;  %v1065_v32 = vmul.f32 %v1064_v60, %v2709_v4  ;;  %v1174_v39 = vmul.f32 %v1070_v6, %v2688_v45  ;;  %v1171_v22 = vmul.f32 %v1058_v59, %v2699_v56 }
 0x28c   :  { %1178 = vrot.lane.b32.xlu0 %v1168_v0, %s2556_s6  ;;  %v1186_v26 = vadd.f32 %v1172_v58, %v1170_v7  ;;  %v1173_v13 = vmul.f32 %v1064_v60, %v2686_v42  ;;  %v1071_v44 = vmul.f32 %v1070_v6, %v2716_v14  ;;  %v1097_v23 = vadd.f32 %v1053_v20, %v2718_v15 }
 0x28d   :  { %v1099_v50 = vadd.f32 %v1065_v32, %v1059_v21  ;;  %v1169_v30 = vmul.f32 %v1052_v12, %v2682_v40  ;;  %v1054_v52 = vmul.f32 %v1052_v12, %v2731_v31  ;;  %v1060_v1 = vmul.f32 %v1058_v59, %v2726_v27 }
 0x28e   :  { %1190 = vrot.lane.b32.xlu1 %v1186_v26, %s2556_s6  ;;  %v1187_v9 = vadd.f32 %v1173_v13, %v1171_v22  ;;  %v1066_v25 = vmul.f32 %v1064_v60, %v2733_v33  ;;  %v1175_v7 = vmul.f32 %v1070_v6, %v2690_v49  ;;  %v1072_v20 = vmul.f32 %v1070_v6, %v2735_v35 }
 0x28f   :  { %v1113_v63 = vadd.f32 %v1099_v50, %v1097_v23  ;;  %v1098_v26 = vadd.f32 %v1054_v52, %v2774_v28 }
 0x290   :  { %v1104_v61 = vpop.permute.xlu1 %1103  ;;  %1200 = vrot.lane.b32.xlu0 %v1174_v39, %s2556_s6  ;;  %v1100_v12 = vadd.f32 %v1066_v25, %v1060_v1 }
 0x291   :  { %v1109_v2 = vadd.f32 %v1104_v61, %v1071_v44 }
 0x292   :  { %v1118_v3 = vpop.permute.xlu0 %1117  ;;  %1180 = vrot.lane.b32.xlu1 %v1169_v30, %s2556_s6  ;;  %v1114_v13 = vadd.f32 %v1100_v12, %v1098_v26 }
 0x293   :  { %v1123_v62 = vadd.f32 %v1118_v3, %v1109_v2 }
 0x294   :  { %v1130_v0 = vpop.permute.xlu1 %1129  ;;  %1192 = vrot.lane.b32.xlu0 %v1187_v9, %s2556_s6 }
 0x295   :  { %v1125_v58 = vadd.f32 %v1123_v62, %v1113_v63 }
 0x296   :  { %v1106_v21 = vpop.permute.xlu0 %1105  ;;  %1202 = vrot.lane.b32.xlu1 %v1175_v7, %s2556_s6 }
 0x297   :  { %v1135_v32 = vadd.f32 %v1130_v0, %v1125_v58  ;;  %v1110_v59 = vadd.f32 %v1106_v21, %v1072_v20 }
 0x298   :  { %v1120_v39 = vpop.permute.xlu1 %1119  ;;  %1222 = vrot.lane.b32.xlu0 %v1043_v11, %s2556_s6 }
 0x299   :  { %v2218_v60 = vmul.f32 -1.442695, %v1135_v32  ;;  %v1124_v22 = vadd.f32 %v1120_v39, %v1110_v59  ;;  %v2118_v59 = vsel %vm50_vm1, %v2793_v5, %v2849_v34 }
 0x29a   :  { %v1132_v23 = vpop.permute.xlu0 %1131 }
 0x29b   :  { %2396 = vpow2.f32 %v2218_v60  ;;  %v1126_v44 = vadd.f32 %v1124_v22, %v1114_v13 }
 0x29c   :  { %v1152_v25 = vpop.permute.xlu1 %1151 }
 0x29d   :  { %v1136_v50 = vadd.f32 %v1132_v23, %v1126_v44 }
 0x29f   :  { %2398 = vtanh.f32 %v1136_v50  ;;  %v2219_v30 = vmul.f32 -1.442695, %v1136_v50 }
 0x2a5   :  { %v2397_v6 = vpop.eup %2396 }
 0x2a6   :  { %v1143_v61 = vadd.f32 1.0, %v2397_v6 }
 0x2a8   :  { %2400 = vrcp.f32 %v1143_v61 }
 0x2a9   :  { %2402 = vpow2.f32 %v2219_v30  ;;  %v2399_v2 = vpop.eup %2398 }
 0x2aa   :  { %v1156_v3 = vrot.slane %v2399_v2, 4 }
 0x2b2   :  { %v2401_v9 = vpop.eup %2400 }
 0x2b3   :  { %v1158_v52 = vmul.f32 %v2401_v9, %v1156_v3  ;;  %v2403_v1 = vpop.eup %2402  ;;  %v1154_v62 = vmul.f32 %v2401_v9, %v1152_v25 }
 0x2b4   :  { %v1144_v63 = vadd.f32 1.0, %v2403_v1 }
 0x2b5   :  { %v1160_v11 = vrot.slane %v1158_v52, 4 }
 0x2b7   :  { %v1162_v0 = vadd.f32 %v1160_v11, %v1154_v62 }
 0x2b9   :  { %2404 = vtanh.f32 %v1162_v0 }
 0x2ba   :  { %2406 = vrcp.f32 %v1144_v63 }
 0x2c3   :  { %v2405_v7 = vpop.eup %2404 }
 0x2c4   :  { %v1165_v58 = vrot.slane %v2405_v7, 4  ;;  %v2407_v20 = vpop.eup %2406 }
 0x2c6   :  { %v1167_v21 = vmul.f32 %v2407_v20, %v1165_v58 }
 0x2c8   :  { %v1266_v26 = vrot.slane %v1167_v21, %v2739_v43  ;;  %v1272_v12 = vrot.slane %v1167_v21, %v2741_v46  ;;  %v1278_v32 = vrot.slane %v1167_v21, %v2743_v47  ;;  %v2911_v39 = vsel %vm2119_vm2, %v2118_v59, %v1167_v21 }
 0x2c9   :  { %v1284_v44 = vrot.slane %v1167_v21, %v2745_v48 }
 0x2ca   :  { %v1267_v60 = vmul.f32 %v1266_v26, %v2712_v8  ;;  %v1273_v22 = vmul.f32 %v1272_v12, %v2714_v10  ;;  %v1279_v13 = vmul.f32 %v1278_v32, %v2720_v17  ;;  %v1274_v6 = vmul.f32 %v1272_v12, %v2749_v54 }
 0x2cb   :  { %v1285_v50 = vmul.f32 %v1284_v44, %v2722_v18  ;;  %v1280_v5 = vmul.f32 %v1278_v32, %v2747_v51  ;;  %v1268_v34 = vmul.f32 %v1266_v26, %v2737_v38  ;;  %v1286_v30 = vmul.f32 %v1284_v44, %v2787_v16 }
 0x2cc   :  { %1293 = vrot.lane.b32.xlu1 %v1267_v60, %s2556_s6  ;;  %v1301_v23 = vadd.f32 %v1279_v13, %v1273_v22 }
 0x2cd   :  { %v1302_v61 = vadd.f32 %v1280_v5, %v1274_v6 }
 0x2ce   :  { %1307 = vrot.lane.b32.xlu0 %v1301_v23, %s2556_s6 }
 0x2d0   :  { %1319 = vrot.lane.b32.xlu1 %v1285_v50, %s2556_s6 }
 0x2d2   :  { %1295 = vrot.lane.b32.xlu0 %v1268_v34, %s2556_s6 }
 0x2d4   :  { %1309 = vrot.lane.b32.xlu1 %v1302_v61, %s2556_s6 }
 0x2d6   :  { %1321 = vrot.lane.b32.xlu0 %v1286_v30, %s2556_s6 }
 0x2d8   :  { %1341 = vrot.lane.b32.xlu1 %v1162_v0, %s2556_s6 }
 0x2fe   :  { %v1179_v2 = vpop.permute.xlu0 %1178 }
 0x2ff   :  { %v1184_v3 = vadd.f32 %v2697_v55, %v1179_v2 }
 0x300   :  { %v1191_v9 = vpop.permute.xlu1 %1190 }
 0x301   :  { %v1196_v52 = vadd.f32 %v1191_v9, %v1184_v3 }
 0x302   :  { %v1201_v1 = vpop.permute.xlu0 %1200 }
 0x303   :  { %v1206_v25 = vadd.f32 %v1201_v1, %v1196_v52 }
 0x304   :  { %v1181_v11 = vpop.permute.xlu1 %1180 }
 0x305   :  { %v2220_v62 = vmul.f32 -1.442695, %v1206_v25  ;;  %v1185_v63 = vadd.f32 %v2694_v53, %v1181_v11 }
 0x306   :  { %v1193_v7 = vpop.permute.xlu0 %1192 }
 0x307   :  { %2408 = vpow2.f32 %v2220_v62  ;;  %v1197_v58 = vadd.f32 %v1193_v7, %v1185_v63 }
 0x308   :  { %v1203_v20 = vpop.permute.xlu1 %1202 }
 0x309   :  { %v1207_v21 = vadd.f32 %v1203_v20, %v1197_v58 }
 0x30a   :  { %v1223_v44 = vpop.permute.xlu0 %1222 }
 0x30b   :  { %2410 = vtanh.f32 %v1207_v21  ;;  %v2221_v0 = vmul.f32 -1.442695, %v1207_v21 }
 0x311   :  { %v2409_v26 = vpop.eup %2408 }
 0x312   :  { %v1214_v12 = vadd.f32 1.0, %v2409_v26 }
 0x314   :  { %2412 = vrcp.f32 %v1214_v12 }
 0x315   :  { %2414 = vpow2.f32 %v2221_v0  ;;  %v2411_v32 = vpop.eup %2410 }
 0x316   :  { %v1227_v59 = vrot.slane %v2411_v32, 4 }
 0x31e   :  { %v2413_v60 = vpop.eup %2412 }
 0x31f   :  { %v1229_v22 = vmul.f32 %v2413_v60, %v1227_v59  ;;  %v2415_v13 = vpop.eup %2414  ;;  %v1225_v23 = vmul.f32 %v2413_v60, %v1223_v44 }
 0x320   :  { %v1215_v6 = vadd.f32 1.0, %v2415_v13 }
 0x321   :  { %v1231_v50 = vrot.slane %v1229_v22, 4 }
 0x323   :  { %v1233_v5 = vadd.f32 %v1231_v50, %v1225_v23 }
 0x325   :  { %2416 = vtanh.f32 %v1233_v5 }
 0x326   :  { %2418 = vrcp.f32 %v1215_v6 }
 0x32f   :  { %v2417_v34 = vpop.eup %2416 }
 0x330   :  { %v1236_v61 = vrot.slane %v2417_v34, 4  ;;  %v2419_v30 = vpop.eup %2418 }
 0x332   :  { %v1238_v2 = vmul.f32 %v2419_v30, %v1236_v61 }
 0x334   :  { %v1242_v3 = vrot.slane %v1238_v2, %v2739_v43  ;;  %v1248_v9 = vrot.slane %v1238_v2, %v2741_v46  ;;  %v1254_v52 = vrot.slane %v1238_v2, %v2743_v47  ;;  %v1260_v62 = vrot.slane %v1238_v2, %v2745_v48 }
 0x336   :  { %v1358_v1 = vmul.f32 %v1242_v3, %v2684_v41  ;;  %v1360_v25 = vmul.f32 %v1248_v9, %v2678_v36  ;;  %v1362_v11 = vmul.f32 %v1254_v52, %v2680_v37  ;;  %v1243_v7 = vmul.f32 %v1242_v3, %v2724_v24 }
 0x337   :  { %v1249_v58 = vmul.f32 %v1248_v9, %v2701_v57  ;;  %v1255_v20 = vmul.f32 %v1254_v52, %v2709_v4  ;;  %v1364_v21 = vmul.f32 %v1260_v62, %v2688_v45  ;;  %v1361_v26 = vmul.f32 %v1248_v9, %v2699_v56 }
 0x338   :  { %1368 = vrot.lane.b32.xlu0 %v1358_v1, %s2556_s6  ;;  %v1376_v63 = vadd.f32 %v1362_v11, %v1360_v25  ;;  %v1363_v12 = vmul.f32 %v1254_v52, %v2686_v42  ;;  %v1359_v0 = vmul.f32 %v1242_v3, %v2682_v40  ;;  %v1261_v32 = vmul.f32 %v1260_v62, %v2716_v14 }
 0x339   :  { %v1287_v59 = vadd.f32 %v1243_v7, %v2718_v15  ;;  %v1289_v60 = vadd.f32 %v1255_v20, %v1249_v58  ;;  %v1365_v50 = vmul.f32 %v1260_v62, %v2690_v49  ;;  %v1244_v6 = vmul.f32 %v1242_v3, %v2731_v31 }
 0x33a   :  { %1380 = vrot.lane.b32.xlu1 %v1376_v63, %s2556_s6  ;;  %v1377_v13 = vadd.f32 %v1363_v12, %v1361_v26  ;;  %v1250_v34 = vmul.f32 %v1248_v9, %v2726_v27  ;;  %v1256_v61 = vmul.f32 %v1254_v52, %v2733_v33  ;;  %v1262_v11 = vmul.f32 %v1260_v62, %v2735_v35 }
 0x33b   :  { %v1303_v2 = vadd.f32 %v1289_v60, %v1287_v59  ;;  %v1288_v7 = vadd.f32 %v1244_v6, %v2774_v28 }
 0x33c   :  { %1390 = vrot.lane.b32.xlu0 %v1364_v21, %s2556_s6  ;;  %v1290_v58 = vadd.f32 %v1256_v61, %v1250_v34 }
 0x33e   :  { %v1294_v22 = vpop.permute.xlu1 %1293  ;;  %1370 = vrot.lane.b32.xlu1 %v1359_v0, %s2556_s6  ;;  %v1304_v52 = vadd.f32 %v1290_v58, %v1288_v7 }
 0x33f   :  { %v1299_v44 = vadd.f32 %v1294_v22, %v1261_v32 }
 0x340   :  { %v1308_v23 = vpop.permute.xlu0 %1307  ;;  %1382 = vrot.lane.b32.xlu0 %v1377_v13, %s2556_s6 }
 0x341   :  { %v1313_v30 = vadd.f32 %v1308_v23, %v1299_v44 }
 0x342   :  { %v1320_v1 = vpop.permute.xlu1 %1319  ;;  %1392 = vrot.lane.b32.xlu1 %v1365_v50, %s2556_s6 }
 0x343   :  { %v1315_v25 = vadd.f32 %v1313_v30, %v1303_v2 }
 0x344   :  { %v1296_v63 = vpop.permute.xlu0 %1295  ;;  %1412 = vrot.lane.b32.xlu0 %v1233_v5, %s2556_s6 }
 0x345   :  { %v1325_v20 = vadd.f32 %v1320_v1, %v1315_v25  ;;  %v1300_v3 = vadd.f32 %v1296_v63, %v1262_v11 }
 0x346   :  { %v1310_v21 = vpop.permute.xlu1 %1309 }
 0x347   :  { %v2222_v9 = vmul.f32 -1.442695, %v1325_v20  ;;  %v1314_v26 = vadd.f32 %v1310_v21, %v1300_v3 }
 0x348   :  { %v1322_v0 = vpop.permute.xlu0 %1321 }
 0x349   :  { %2420 = vpow2.f32 %v2222_v9  ;;  %v1316_v12 = vadd.f32 %v1314_v26, %v1304_v52 }
 0x34a   :  { %v1342_v50 = vpop.permute.xlu1 %1341 }
 0x34b   :  { %v1326_v32 = vadd.f32 %v1322_v0, %v1316_v12 }
 0x34d   :  { %2422 = vtanh.f32 %v1326_v32  ;;  %v2223_v62 = vmul.f32 -1.442695, %v1326_v32 }
 0x353   :  { %v2421_v59 = vpop.eup %2420 }
 0x354   :  { %v1333_v60 = vadd.f32 1.0, %v2421_v59 }
 0x356   :  { %2424 = vrcp.f32 %v1333_v60 }
 0x357   :  { %2426 = vpow2.f32 %v2223_v62  ;;  %v2423_v5 = vpop.eup %2422 }
 0x358   :  { %v1346_v22 = vrot.slane %v2423_v5, 4 }
 0x360   :  { %v2425_v13 = vpop.eup %2424 }
 0x361   :  { %v1348_v44 = vmul.f32 %v2425_v13, %v1346_v22  ;;  %v2427_v23 = vpop.eup %2426  ;;  %v1344_v34 = vmul.f32 %v2425_v13, %v1342_v50 }
 0x362   :  { %v1334_v61 = vadd.f32 1.0, %v2427_v23 }
 0x363   :  { %v1350_v6 = vrot.slane %v1348_v44, 4 }
 0x365   :  { %v1352_v30 = vadd.f32 %v1350_v6, %v1344_v34 }
 0x367   :  { %2428 = vtanh.f32 %v1352_v30 }
 0x368   :  { %2430 = vrcp.f32 %v1334_v61 }
 0x371   :  { %v2429_v2 = vpop.eup %2428 }
 0x372   :  { %v1355_v1 = vrot.slane %v2429_v2, 4  ;;  %v2431_v25 = vpop.eup %2430 }
 0x374   :  { %v1357_v11 = vmul.f32 %v2431_v25, %v1355_v1 }
 0x376   :  { %v1456_v63 = vrot.slane %v1357_v11, %v2739_v43  ;;  %v1462_v7 = vrot.slane %v1357_v11, %v2741_v46  ;;  %v1468_v58 = vrot.slane %v1357_v11, %v2743_v47  ;;  %v2964_v20 = vsel %vm2121_vm3, %v2911_v39, %v1357_v11 }
 0x377   :  { %v1474_v26 = vrot.slane %v1357_v11, %v2745_v48 }
 0x378   :  { %v1457_v3 = vmul.f32 %v1456_v63, %v2712_v8  ;;  %v1463_v21 = vmul.f32 %v1462_v7, %v2714_v10  ;;  %v1469_v9 = vmul.f32 %v1468_v58, %v2720_v17  ;;  %v1464_v0 = vmul.f32 %v1462_v7, %v2749_v54 }
 0x379   :  { %v1475_v12 = vmul.f32 %v1474_v26, %v2722_v18  ;;  %v1470_v39 = vmul.f32 %v1468_v58, %v2747_v51  ;;  %v1458_v32 = vmul.f32 %v1456_v63, %v2737_v38  ;;  %v1476_v60 = vmul.f32 %v1474_v26, %v2787_v16 }
 0x37a   :  { %1483 = vrot.lane.b32.xlu1 %v1457_v3, %s2556_s6  ;;  %v1491_v52 = vadd.f32 %v1469_v9, %v1463_v21 }
 0x37b   :  { %v1492_v59 = vadd.f32 %v1470_v39, %v1464_v0 }
 0x37c   :  { %1497 = vrot.lane.b32.xlu0 %v1491_v52, %s2556_s6 }
 0x37e   :  { %1509 = vrot.lane.b32.xlu1 %v1475_v12, %s2556_s6 }
 0x380   :  { %1485 = vrot.lane.b32.xlu0 %v1458_v32, %s2556_s6 }
 0x382   :  { %1499 = vrot.lane.b32.xlu1 %v1492_v59, %s2556_s6 }
 0x384   :  { %1511 = vrot.lane.b32.xlu0 %v1476_v60, %s2556_s6 }
 0x386   :  { %1531 = vrot.lane.b32.xlu1 %v1352_v30, %s2556_s6 }
 0x3aa   :  { %v1369_v62 = vpop.permute.xlu0 %1368 }
 0x3ab   :  { %v1374_v5 = vadd.f32 %v2697_v55, %v1369_v62 }
 0x3ac   :  { %v1381_v22 = vpop.permute.xlu1 %1380 }
 0x3ad   :  { %v1386_v13 = vadd.f32 %v1381_v22, %v1374_v5 }
 0x3ae   :  { %v1391_v44 = vpop.permute.xlu0 %1390 }
 0x3af   :  { %v1396_v23 = vadd.f32 %v1391_v44, %v1386_v13 }
 0x3b0   :  { %v1371_v50 = vpop.permute.xlu1 %1370 }
 0x3b1   :  { %v2224_v6 = vmul.f32 -1.442695, %v1396_v23  ;;  %v1375_v34 = vadd.f32 %v2694_v53, %v1371_v50 }
 0x3b2   :  { %v1383_v61 = vpop.permute.xlu0 %1382 }
 0x3b3   :  { %2432 = vpow2.f32 %v2224_v6  ;;  %v1387_v2 = vadd.f32 %v1383_v61, %v1375_v34 }
 0x3b4   :  { %v1393_v1 = vpop.permute.xlu1 %1392 }
 0x3b5   :  { %v1397_v25 = vadd.f32 %v1393_v1, %v1387_v2 }
 0x3b6   :  { %v1413_v26 = vpop.permute.xlu0 %1412 }
 0x3b7   :  { %2434 = vtanh.f32 %v1397_v25  ;;  %v2225_v30 = vmul.f32 -1.442695, %v1397_v25 }
 0x3bd   :  { %v2433_v11 = vpop.eup %2432 }
 0x3be   :  { %v1404_v63 = vadd.f32 1.0, %v2433_v11 }
 0x3c0   :  { %2436 = vrcp.f32 %v1404_v63 }
 0x3c1   :  { %2438 = vpow2.f32 %v2225_v30  ;;  %v2435_v7 = vpop.eup %2434 }
 0x3c2   :  { %v1417_v58 = vrot.slane %v2435_v7, 4 }
 0x3ca   :  { %v2437_v3 = vpop.eup %2436 }
 0x3cb   :  { %v1419_v21 = vmul.f32 %v2437_v3, %v1417_v58  ;;  %v2439_v9 = vpop.eup %2438  ;;  %v1415_v52 = vmul.f32 %v2437_v3, %v1413_v26 }
 0x3cc   :  { %v1405_v0 = vadd.f32 1.0, %v2439_v9 }
 0x3cd   :  { %v1421_v12 = vrot.slane %v1419_v21, 4 }
 0x3cf   :  { %v1423_v39 = vadd.f32 %v1421_v12, %v1415_v52 }
 0x3d1   :  { %2440 = vtanh.f32 %v1423_v39 }
 0x3d2   :  { %2442 = vrcp.f32 %v1405_v0 }
 0x3db   :  { %v2441_v32 = vpop.eup %2440 }
 0x3dc   :  { %v1426_v59 = vrot.slane %v2441_v32, 4  ;;  %v2443_v60 = vpop.eup %2442 }
 0x3de   :  { %v1428_v62 = vmul.f32 %v2443_v60, %v1426_v59 }
 0x3e0   :  { %v1432_v5 = vrot.slane %v1428_v62, %v2739_v43  ;;  %v1438_v22 = vrot.slane %v1428_v62, %v2741_v46  ;;  %v1444_v13 = vrot.slane %v1428_v62, %v2743_v47  ;;  %v1450_v6 = vrot.slane %v1428_v62, %v2745_v48 }
 0x3e2   :  { %v1548_v44 = vmul.f32 %v1432_v5, %v2684_v41  ;;  %v1550_v23 = vmul.f32 %v1438_v22, %v2678_v36  ;;  %v1552_v50 = vmul.f32 %v1444_v13, %v2680_v37  ;;  %v1554_v61 = vmul.f32 %v1450_v6, %v2688_v45 }
 0x3e3   :  { %v1551_v2 = vmul.f32 %v1438_v22, %v2699_v56  ;;  %v1553_v1 = vmul.f32 %v1444_v13, %v2686_v42  ;;  %v1433_v25 = vmul.f32 %v1432_v5, %v2724_v24  ;;  %v1439_v11 = vmul.f32 %v1438_v22, %v2701_v57 }
 0x3e4   :  { %1558 = vrot.lane.b32.xlu0 %v1548_v44, %s2556_s6  ;;  %v1566_v34 = vadd.f32 %v1552_v50, %v1550_v23  ;;  %v1445_v63 = vmul.f32 %v1444_v13, %v2709_v4  ;;  %v1549_v30 = vmul.f32 %v1432_v5, %v2682_v40  ;;  %v1451_v58 = vmul.f32 %v1450_v6, %v2716_v14 }
 0x3e5   :  { %v1567_v7 = vadd.f32 %v1553_v1, %v1551_v2  ;;  %v1477_v3 = vadd.f32 %v1433_v25, %v2718_v15  ;;  %v1555_v26 = vmul.f32 %v1450_v6, %v2690_v49  ;;  %v1434_v0 = vmul.f32 %v1432_v5, %v2731_v31 }
 0x3e6   :  { %1570 = vrot.lane.b32.xlu1 %v1566_v34, %s2556_s6  ;;  %v1479_v21 = vadd.f32 %v1445_v63, %v1439_v11  ;;  %v1440_v32 = vmul.f32 %v1438_v22, %v2726_v27  ;;  %v1446_v59 = vmul.f32 %v1444_v13, %v2733_v33  ;;  %v1452_v50 = vmul.f32 %v1450_v6, %v2735_v35 }
 0x3e8   :  { %1580 = vrot.lane.b32.xlu0 %v1554_v61, %s2556_s6  ;;  %v1493_v62 = vadd.f32 %v1479_v21, %v1477_v3  ;;  %v1478_v61 = vadd.f32 %v1434_v0, %v2774_v28  ;;  %v1480_v2 = vadd.f32 %v1446_v59, %v1440_v32 }
 0x3ea   :  { %1560 = vrot.lane.b32.xlu1 %v1549_v30, %s2556_s6  ;;  %v1494_v22 = vadd.f32 %v1480_v2, %v1478_v61 }
 0x3ec   :  { %v1484_v9 = vpop.permute.xlu1 %1483  ;;  %1572 = vrot.lane.b32.xlu0 %v1567_v7, %s2556_s6 }
 0x3ed   :  { %v1489_v52 = vadd.f32 %v1484_v9, %v1451_v58 }
 0x3ee   :  { %v1498_v12 = vpop.permute.xlu0 %1497  ;;  %1582 = vrot.lane.b32.xlu1 %v1555_v26, %s2556_s6 }
 0x3ef   :  { %v1503_v60 = vadd.f32 %v1498_v12, %v1489_v52 }
 0x3f0   :  { %v1510_v44 = vpop.permute.xlu1 %1509  ;;  %1602 = vrot.lane.b32.xlu0 %v1423_v39, %s2556_s6 }
 0x3f1   :  { %v1505_v23 = vadd.f32 %v1503_v60, %v1493_v62 }
 0x3f2   :  { %v1486_v34 = vpop.permute.xlu0 %1485 }
 0x3f3   :  { %v1515_v1 = vadd.f32 %v1510_v44, %v1505_v23  ;;  %v1490_v25 = vadd.f32 %v1486_v34, %v1452_v50 }
 0x3f4   :  { %v1500_v11 = vpop.permute.xlu1 %1499 }
 0x3f5   :  { %v2226_v5 = vmul.f32 -1.442695, %v1515_v1  ;;  %v1504_v63 = vadd.f32 %v1500_v11, %v1490_v25 }
 0x3f6   :  { %v1512_v30 = vpop.permute.xlu0 %1511 }
 0x3f7   :  { %2444 = vpow2.f32 %v2226_v5  ;;  %v1506_v13 = vadd.f32 %v1504_v63, %v1494_v22 }
 0x3f8   :  { %v1532_v12 = vpop.permute.xlu1 %1531 }
 0x3f9   :  { %v1516_v7 = vadd.f32 %v1512_v30, %v1506_v13 }
 0x3fb   :  { %2446 = vtanh.f32 %v1516_v7  ;;  %v2227_v3 = vmul.f32 -1.442695, %v1516_v7 }
 0x401   :  { %v2445_v58 = vpop.eup %2444 }
 0x402   :  { %v1523_v39 = vadd.f32 1.0, %v2445_v58 }
 0x404   :  { %2448 = vrcp.f32 %v1523_v39 }
 0x405   :  { %2450 = vpow2.f32 %v2227_v3  ;;  %v2447_v6 = vpop.eup %2446 }
 0x406   :  { %v1536_v21 = vrot.slane %v2447_v6, 4 }
 0x40e   :  { %v2449_v9 = vpop.eup %2448 }
 0x40f   :  { %v1538_v26 = vmul.f32 %v2449_v9, %v1536_v21  ;;  %v2451_v52 = vpop.eup %2450  ;;  %v1534_v32 = vmul.f32 %v2449_v9, %v1532_v12 }
 0x410   :  { %v1524_v59 = vadd.f32 1.0, %v2451_v52 }
 0x411   :  { %v1540_v0 = vrot.slane %v1538_v26, 4 }
 0x413   :  { %v1542_v60 = vadd.f32 %v1540_v0, %v1534_v32 }
 0x415   :  { %2452 = vtanh.f32 %v1542_v60 }
 0x416   :  { %2454 = vrcp.f32 %v1524_v59 }
 0x41f   :  { %v2453_v62 = vpop.eup %2452 }
 0x420   :  { %v1545_v44 = vrot.slane %v2453_v62, 4  ;;  %v2455_v23 = vpop.eup %2454 }
 0x422   :  { %v1547_v50 = vmul.f32 %v2455_v23, %v1545_v44 }
 0x424   :  { %v1646_v34 = vrot.slane %v1547_v50, %v2739_v43  ;;  %v1652_v61 = vrot.slane %v1547_v50, %v2741_v46  ;;  %v1658_v2 = vrot.slane %v1547_v50, %v2743_v47  ;;  %v3017_v1 = vsel %vm2123_vm4, %v2964_v20, %v1547_v50 }
 0x425   :  { %v1664_v63 = vrot.slane %v1547_v50, %v2745_v48 }
 0x426   :  { %v1647_v25 = vmul.f32 %v1646_v34, %v2712_v8  ;;  %v1653_v11 = vmul.f32 %v1652_v61, %v2714_v10  ;;  %v1659_v5 = vmul.f32 %v1658_v2, %v2720_v17  ;;  %v1654_v30 = vmul.f32 %v1652_v61, %v2749_v54 }
 0x427   :  { %v1665_v13 = vmul.f32 %v1664_v63, %v2722_v18  ;;  %v1660_v20 = vmul.f32 %v1658_v2, %v2747_v51  ;;  %v1648_v7 = vmul.f32 %v1646_v34, %v2737_v38  ;;  %v1666_v39 = vmul.f32 %v1664_v63, %v2787_v16 }
 0x428   :  { %1673 = vrot.lane.b32.xlu1 %v1647_v25, %s2556_s6  ;;  %v1681_v22 = vadd.f32 %v1659_v5, %v1653_v11 }
 0x429   :  { %v1682_v58 = vadd.f32 %v1660_v20, %v1654_v30 }
 0x42a   :  { %1687 = vrot.lane.b32.xlu0 %v1681_v22, %s2556_s6 }
 0x42c   :  { %1699 = vrot.lane.b32.xlu1 %v1665_v13, %s2556_s6 }
 0x42e   :  { %1675 = vrot.lane.b32.xlu0 %v1648_v7, %s2556_s6 }
 0x430   :  { %1689 = vrot.lane.b32.xlu1 %v1682_v58, %s2556_s6 }
 0x432   :  { %1701 = vrot.lane.b32.xlu0 %v1666_v39, %s2556_s6 }
 0x434   :  { %1721 = vrot.lane.b32.xlu1 %v1542_v60, %s2556_s6 }
 0x456   :  { %v1559_v3 = vpop.permute.xlu0 %1558 }
 0x457   :  { %v1564_v6 = vadd.f32 %v2697_v55, %v1559_v3 }
 0x458   :  { %v1571_v21 = vpop.permute.xlu1 %1570 }
 0x459   :  { %v1576_v9 = vadd.f32 %v1571_v21, %v1564_v6 }
 0x45a   :  { %v1581_v26 = vpop.permute.xlu0 %1580 }
 0x45b   :  { %v1586_v52 = vadd.f32 %v1581_v26, %v1576_v9 }
 0x45c   :  { %v1561_v12 = vpop.permute.xlu1 %1560 }
 0x45d   :  { %v2228_v0 = vmul.f32 -1.442695, %v1586_v52  ;;  %v1565_v32 = vadd.f32 %v2694_v53, %v1561_v12 }
 0x45e   :  { %v1573_v59 = vpop.permute.xlu0 %1572 }
 0x45f   :  { %2456 = vpow2.f32 %v2228_v0  ;;  %v1577_v62 = vadd.f32 %v1573_v59, %v1565_v32 }
 0x460   :  { %v1583_v44 = vpop.permute.xlu1 %1582 }
 0x461   :  { %v1587_v23 = vadd.f32 %v1583_v44, %v1577_v62 }
 0x462   :  { %v1603_v63 = vpop.permute.xlu0 %1602 }
 0x463   :  { %2458 = vtanh.f32 %v1587_v23  ;;  %v2229_v60 = vmul.f32 -1.442695, %v1587_v23 }
 0x469   :  { %v2457_v50 = vpop.eup %2456 }
 0x46a   :  { %v1594_v34 = vadd.f32 1.0, %v2457_v50 }
 0x46c   :  { %2460 = vrcp.f32 %v1594_v34 }
 0x46d   :  { %2462 = vpow2.f32 %v2229_v60  ;;  %v2459_v61 = vpop.eup %2458 }
 0x46e   :  { %v1607_v2 = vrot.slane %v2459_v61, 4 }
 0x476   :  { %v2461_v25 = vpop.eup %2460 }
 0x477   :  { %v1609_v11 = vmul.f32 %v2461_v25, %v1607_v2  ;;  %v2463_v5 = vpop.eup %2462  ;;  %v1605_v22 = vmul.f32 %v2461_v25, %v1603_v63 }
 0x478   :  { %v1595_v30 = vadd.f32 1.0, %v2463_v5 }
 0x479   :  { %v1611_v13 = vrot.slane %v1609_v11, 4 }
 0x47b   :  { %v1613_v20 = vadd.f32 %v1611_v13, %v1605_v22 }
 0x47d   :  { %2464 = vtanh.f32 %v1613_v20 }
 0x47e   :  { %2466 = vrcp.f32 %v1595_v30 }
 0x487   :  { %v2465_v7 = vpop.eup %2464 }
 0x488   :  { %v1616_v58 = vrot.slane %v2465_v7, 4  ;;  %v2467_v39 = vpop.eup %2466 }
 0x48a   :  { %v1618_v3 = vmul.f32 %v2467_v39, %v1616_v58 }
 0x48c   :  { %v1628_v6 = vrot.slane %v1618_v3, %v2741_v46  ;;  %v1634_v21 = vrot.slane %v1618_v3, %v2743_v47  ;;  %v1622_v9 = vrot.slane %v1618_v3, %v2739_v43  ;;  %v1640_v0 = vrot.slane %v1618_v3, %v2745_v48 }
 0x48e   :  { %v1738_v26 = vmul.f32 %v1622_v9, %v2684_v41  ;;  %v1740_v52 = vmul.f32 %v1628_v6, %v2678_v36  ;;  %v1742_v12 = vmul.f32 %v1634_v21, %v2680_v37  ;;  %v1744_v59 = vmul.f32 %v1640_v0, %v2688_v45 }
 0x48f   :  { %v1741_v62 = vmul.f32 %v1628_v6, %v2699_v56  ;;  %v1743_v44 = vmul.f32 %v1634_v21, %v2686_v42  ;;  %v1739_v23 = vmul.f32 %v1622_v9, %v2682_v40  ;;  %v1623_v50 = vmul.f32 %v1622_v9, %v2724_v24 }
 0x490   :  { %1748 = vrot.lane.b32.xlu0 %v1738_v26, %s2556_s6  ;;  %v1756_v32 = vadd.f32 %v1742_v12, %v1740_v52  ;;  %v1629_v34 = vmul.f32 %v1628_v6, %v2701_v57  ;;  %v1635_v60 = vmul.f32 %v1634_v21, %v2709_v4  ;;  %v1745_v2 = vmul.f32 %v1640_v0, %v2690_v49 }
 0x491   :  { %v1757_v61 = vadd.f32 %v1743_v44, %v1741_v62  ;;  %v1641_v25 = vmul.f32 %v1640_v0, %v2716_v14  ;;  %v1667_v11 = vadd.f32 %v1623_v50, %v2718_v15  ;;  %v1624_v30 = vmul.f32 %v1622_v9, %v2731_v31 }
 0x492   :  { %1760 = vrot.lane.b32.xlu1 %v1756_v32, %s2556_s6  ;;  %v1669_v5 = vadd.f32 %v1635_v60, %v1629_v34  ;;  %v1630_v7 = vmul.f32 %v1628_v6, %v2726_v27  ;;  %v1636_v58 = vmul.f32 %v1634_v21, %v2733_v33  ;;  %v1642_v12 = vmul.f32 %v1640_v0, %v2735_v35 }
 0x494   :  { %1770 = vrot.lane.b32.xlu0 %v1744_v59, %s2556_s6  ;;  %v1683_v3 = vadd.f32 %v1669_v5, %v1667_v11  ;;  %v1668_v59 = vadd.f32 %v1624_v30, %v2774_v28  ;;  %v1670_v62 = vadd.f32 %v1636_v58, %v1630_v7 }
 0x496   :  { %1750 = vrot.lane.b32.xlu1 %v1739_v23, %s2556_s6  ;;  %v1684_v9 = vadd.f32 %v1670_v62, %v1668_v59 }
 0x498   :  { %1762 = vrot.lane.b32.xlu0 %v1757_v61, %s2556_s6 }
 0x49a   :  { %v1674_v63 = vpop.permute.xlu1 %1673  ;;  %1772 = vrot.lane.b32.xlu1 %v1745_v2, %s2556_s6 }
 0x49b   :  { %v1679_v22 = vadd.f32 %v1674_v63, %v1641_v25 }
 0x49c   :  { %v1688_v13 = vpop.permute.xlu0 %1687  ;;  %1792 = vrot.lane.b32.xlu0 %v1613_v20, %s2556_s6 }
 0x49d   :  { %v1693_v39 = vadd.f32 %v1688_v13, %v1679_v22 }
 0x49e   :  { %v1700_v26 = vpop.permute.xlu1 %1699 }
 0x49f   :  { %v1695_v52 = vadd.f32 %v1693_v39, %v1683_v3 }
 0x4a0   :  { %v1676_v32 = vpop.permute.xlu0 %1675 }
 0x4a1   :  { %v1705_v44 = vadd.f32 %v1700_v26, %v1695_v52  ;;  %v1680_v23 = vadd.f32 %v1676_v32, %v1642_v12 }
 0x4a2   :  { %v1690_v50 = vpop.permute.xlu1 %1689 }
 0x4a3   :  { %v2230_v20 = vmul.f32 -1.442695, %v1705_v44  ;;  %v1694_v34 = vadd.f32 %v1690_v50, %v1680_v23 }
 0x4a4   :  { %v1702_v60 = vpop.permute.xlu0 %1701 }
 0x4a5   :  { %2468 = vpow2.f32 %v2230_v20  ;;  %v1696_v6 = vadd.f32 %v1694_v34, %v1684_v9 }
 0x4a6   :  { %v1722_v13 = vpop.permute.xlu1 %1721 }
 0x4a7   :  { %v1706_v21 = vadd.f32 %v1702_v60, %v1696_v6 }
 0x4a9   :  { %2470 = vtanh.f32 %v1706_v21  ;;  %v2231_v25 = vmul.f32 -1.442695, %v1706_v21 }
 0x4af   :  { %v2469_v61 = vpop.eup %2468 }
 0x4b0   :  { %v1713_v2 = vadd.f32 1.0, %v2469_v61 }
 0x4b2   :  { %2472 = vrcp.f32 %v1713_v2 }
 0x4b3   :  { %2474 = vpow2.f32 %v2231_v25  ;;  %v2471_v0 = vpop.eup %2470 }
 0x4b4   :  { %v1726_v11 = vrot.slane %v2471_v0, 4 }
 0x4bc   :  { %v2473_v5 = vpop.eup %2472 }
 0x4bd   :  { %v1728_v63 = vmul.f32 %v2473_v5, %v1726_v11  ;;  %v2475_v22 = vpop.eup %2474  ;;  %v1724_v7 = vmul.f32 %v2473_v5, %v1722_v13 }
 0x4be   :  { %v1714_v58 = vadd.f32 1.0, %v2475_v22 }
 0x4bf   :  { %v1730_v30 = vrot.slane %v1728_v63, 4 }
 0x4c1   :  { %v1732_v39 = vadd.f32 %v1730_v30, %v1724_v7 }
 0x4c3   :  { %2476 = vtanh.f32 %v1732_v39 }
 0x4c4   :  { %2478 = vrcp.f32 %v1714_v58 }
 0x4cd   :  { %v2477_v3 = vpop.eup %2476 }
 0x4ce   :  { %v1735_v26 = vrot.slane %v2477_v3, 4  ;;  %v2479_v52 = vpop.eup %2478 }
 0x4d0   :  { %v1737_v12 = vmul.f32 %v2479_v52, %v1735_v26 }
 0x4d2   :  { %v1836_v32 = vrot.slane %v1737_v12, %v2739_v43  ;;  %v1842_v59 = vrot.slane %v1737_v12, %v2741_v46  ;;  %v1848_v62 = vrot.slane %v1737_v12, %v2743_v47  ;;  %v3070_v44 = vsel %vm2125_vm5, %v3017_v1, %v1737_v12 }
 0x4d3   :  { %v1854_v34 = vrot.slane %v1737_v12, %v2745_v48 }
 0x4d4   :  { %v1837_v23 = vmul.f32 %v1836_v32, %v2712_v8  ;;  %v1843_v50 = vmul.f32 %v1842_v59, %v2714_v10  ;;  %v1849_v20 = vmul.f32 %v1848_v62, %v2720_v17  ;;  %v1844_v60 = vmul.f32 %v1842_v59, %v2749_v54 }
 0x4d5   :  { %v1855_v6 = vmul.f32 %v1854_v34, %v2722_v18  ;;  %v1850_v1 = vmul.f32 %v1848_v62, %v2747_v51  ;;  %v1838_v21 = vmul.f32 %v1836_v32, %v2737_v38  ;;  %v1856_v2 = vmul.f32 %v1854_v34, %v2787_v16 }
 0x4d6   :  { %1863 = vrot.lane.b32.xlu1 %v1837_v23, %s2556_s6  ;;  %v1871_v9 = vadd.f32 %v1849_v20, %v1843_v50 }
 0x4d7   :  { %v1872_v61 = vadd.f32 %v1850_v1, %v1844_v60 }
 0x4d8   :  { %1877 = vrot.lane.b32.xlu0 %v1871_v9, %s2556_s6 }
 0x4da   :  { %1889 = vrot.lane.b32.xlu1 %v1855_v6, %s2556_s6 }
 0x4dc   :  { %1865 = vrot.lane.b32.xlu0 %v1838_v21, %s2556_s6 }
 0x4de   :  { %1879 = vrot.lane.b32.xlu1 %v1872_v61, %s2556_s6 }
 0x4e0   :  { %1891 = vrot.lane.b32.xlu0 %v1856_v2, %s2556_s6 }
 0x4e2   :  { %1911 = vrot.lane.b32.xlu1 %v1732_v39, %s2556_s6 }
 0x502   :  { %v1749_v25 = vpop.permute.xlu0 %1748 }
 0x503   :  { %v1754_v0 = vadd.f32 %v2697_v55, %v1749_v25 }
 0x504   :  { %v1761_v11 = vpop.permute.xlu1 %1760 }
 0x505   :  { %v1766_v5 = vadd.f32 %v1761_v11, %v1754_v0 }
 0x506   :  { %v1771_v63 = vpop.permute.xlu0 %1770 }
 0x507   :  { %v1776_v22 = vadd.f32 %v1771_v63, %v1766_v5 }
 0x508   :  { %v1751_v13 = vpop.permute.xlu1 %1750 }
 0x509   :  { %v2232_v30 = vmul.f32 -1.442695, %v1776_v22  ;;  %v1755_v7 = vadd.f32 %v2694_v53, %v1751_v13 }
 0x50a   :  { %v1763_v58 = vpop.permute.xlu0 %1762 }
 0x50b   :  { %2480 = vpow2.f32 %v2232_v30  ;;  %v1767_v3 = vadd.f32 %v1763_v58, %v1755_v7 }
 0x50c   :  { %v1773_v26 = vpop.permute.xlu1 %1772 }
 0x50d   :  { %v1777_v52 = vadd.f32 %v1773_v26, %v1767_v3 }
 0x50e   :  { %v1793_v34 = vpop.permute.xlu0 %1792 }
 0x50f   :  { %2482 = vtanh.f32 %v1777_v52  ;;  %v2233_v39 = vmul.f32 -1.442695, %v1777_v52 }
 0x515   :  { %v2481_v12 = vpop.eup %2480 }
 0x516   :  { %v1784_v32 = vadd.f32 1.0, %v2481_v12 }
 0x518   :  { %2484 = vrcp.f32 %v1784_v32 }
 0x519   :  { %2486 = vpow2.f32 %v2233_v39  ;;  %v2483_v59 = vpop.eup %2482 }
 0x51a   :  { %v1797_v62 = vrot.slane %v2483_v59, 4 }
 0x522   :  { %v2485_v23 = vpop.eup %2484 }
 0x523   :  { %v1799_v50 = vmul.f32 %v2485_v23, %v1797_v62  ;;  %v2487_v20 = vpop.eup %2486  ;;  %v1795_v9 = vmul.f32 %v2485_v23, %v1793_v34 }
 0x524   :  { %v1785_v60 = vadd.f32 1.0, %v2487_v20 }
 0x525   :  { %v1801_v6 = vrot.slane %v1799_v50, 4 }
 0x527   :  { %v1803_v1 = vadd.f32 %v1801_v6, %v1795_v9 }
 0x529   :  { %2488 = vtanh.f32 %v1803_v1 }
 0x52a   :  { %2490 = vrcp.f32 %v1785_v60 }
 0x533   :  { %v2489_v21 = vpop.eup %2488 }
 0x534   :  { %v1806_v61 = vrot.slane %v2489_v21, 4  ;;  %v2491_v2 = vpop.eup %2490 }
 0x536   :  { %v1808_v25 = vmul.f32 %v2491_v2, %v1806_v61 }
 0x538   :  { %v1818_v0 = vrot.slane %v1808_v25, %v2741_v46  ;;  %v1824_v11 = vrot.slane %v1808_v25, %v2743_v47  ;;  %v1812_v5 = vrot.slane %v1808_v25, %v2739_v43  ;;  %v1830_v30 = vrot.slane %v1808_v25, %v2745_v48 }
 0x53a   :  { %v1928_v63 = vmul.f32 %v1812_v5, %v2684_v41  ;;  %v1930_v22 = vmul.f32 %v1818_v0, %v2678_v36  ;;  %v1932_v13 = vmul.f32 %v1824_v11, %v2680_v37  ;;  %v1934_v58 = vmul.f32 %v1830_v30, %v2688_v45 }
 0x53b   :  { %v1931_v3 = vmul.f32 %v1818_v0, %v2699_v56  ;;  %v1933_v26 = vmul.f32 %v1824_v11, %v2686_v42  ;;  %v1929_v41 = vmul.f32 %v1812_v5, %v2682_v40  ;;  %v1813_v37 = vmul.f32 %v1812_v5, %v2724_v24 }
 0x53c   :  { %1938 = vrot.lane.b32.xlu0 %v1928_v63, %s2556_s6  ;;  %v1946_v7 = vadd.f32 %v1932_v13, %v1930_v22  ;;  %v1819_v52 = vmul.f32 %v1818_v0, %v2701_v57  ;;  %v1825_v12 = vmul.f32 %v1824_v11, %v2709_v4  ;;  %v1935_v45 = vmul.f32 %v1830_v30, %v2690_v49 }
 0x53d   :  { %v1947_v36 = vadd.f32 %v1933_v26, %v1931_v3  ;;  %v1831_v42 = vmul.f32 %v1830_v30, %v2716_v14  ;;  %v1857_v56 = vadd.f32 %v1813_v37, %v2718_v15  ;;  %v1814_v62 = vmul.f32 %v1812_v5, %v2731_v31 }
 0x53e   :  { %1950 = vrot.lane.b32.xlu1 %v1946_v7, %s2556_s6  ;;  %v1859_v40 = vadd.f32 %v1825_v12, %v1819_v52  ;;  %v1820_v23 = vmul.f32 %v1818_v0, %v2726_v27  ;;  %v1826_v50 = vmul.f32 %v1824_v11, %v2733_v33  ;;  %v1832_v6 = vmul.f32 %v1830_v30, %v2735_v35 }
 0x53f   :  { %v1858_v21 = vadd.f32 %v1814_v62, %v2774_v28 }
 0x540   :  { %1960 = vrot.lane.b32.xlu0 %v1934_v58, %s2556_s6  ;;  %v1873_v49 = vadd.f32 %v1859_v40, %v1857_v56  ;;  %v1860_v61 = vadd.f32 %v1826_v50, %v1820_v23 }
 0x542   :  { %1940 = vrot.lane.b32.xlu1 %v1929_v41, %s2556_s6  ;;  %v1874_v5 = vadd.f32 %v1860_v61, %v1858_v21 }
 0x544   :  { %1952 = vrot.lane.b32.xlu0 %v1947_v36, %s2556_s6 }
 0x546   :  { %1962 = vrot.lane.b32.xlu1 %v1935_v45, %s2556_s6 }
 0x548   :  { %v1864_v32 = vpop.permute.xlu1 %1863  ;;  %1982 = vrot.lane.b32.xlu0 %v1803_v1, %s2556_s6 }
 0x549   :  { %v1869_v39 = vadd.f32 %v1864_v32, %v1831_v42 }
 0x54a   :  { %v1878_v59 = vpop.permute.xlu0 %1877 }
 0x54b   :  { %v1883_v20 = vadd.f32 %v1878_v59, %v1869_v39 }
 0x54c   :  { %v1890_v34 = vpop.permute.xlu1 %1889 }
 0x54d   :  { %v1885_v9 = vadd.f32 %v1883_v20, %v1873_v49 }
 0x54e   :  { %v1866_v60 = vpop.permute.xlu0 %1865 }
 0x54f   :  { %v1895_v2 = vadd.f32 %v1890_v34, %v1885_v9  ;;  %v1870_v1 = vadd.f32 %v1866_v60, %v1832_v6 }
 0x550   :  { %v1880_v25 = vpop.permute.xlu1 %1879 }
 0x551   :  { %v2234_v63 = vmul.f32 -1.442695, %v1895_v2  ;;  %v1884_v22 = vadd.f32 %v1880_v25, %v1870_v1 }
 0x552   :  { %v1892_v13 = vpop.permute.xlu0 %1891 }
 0x553   :  { %2492 = vpow2.f32 %v2234_v63  ;;  %v1886_v0 = vadd.f32 %v1884_v22, %v1874_v5 }
 0x554   :  { %v1912_v52 = vpop.permute.xlu1 %1911 }
 0x555   :  { %v1896_v11 = vadd.f32 %v1892_v13, %v1886_v0 }
 0x557   :  { %2494 = vtanh.f32 %v1896_v11  ;;  %v2235_v3 = vmul.f32 -1.442695, %v1896_v11 }
 0x55d   :  { %v2493_v7 = vpop.eup %2492 }
 0x55e   :  { %v1903_v58 = vadd.f32 1.0, %v2493_v7 }
 0x560   :  { %2496 = vrcp.f32 %v1903_v58 }
 0x561   :  { %2498 = vpow2.f32 %v2235_v3  ;;  %v2495_v30 = vpop.eup %2494 }
 0x562   :  { %v1916_v26 = vrot.slane %v2495_v30, 4 }
 0x56a   :  { %v2497_v41 = vpop.eup %2496 }
 0x56b   :  { %v1918_v36 = vmul.f32 %v2497_v41, %v1916_v26  ;;  %v2499_v37 = vpop.eup %2498  ;;  %v1914_v45 = vmul.f32 %v2497_v41, %v1912_v52 }
 0x56c   :  { %v1904_v42 = vadd.f32 1.0, %v2499_v37 }
 0x56d   :  { %v1920_v12 = vrot.slane %v1918_v36, 4 }
 0x56f   :  { %v1922_v56 = vadd.f32 %v1920_v12, %v1914_v45 }
 0x571   :  { %2500 = vtanh.f32 %v1922_v56 }
 0x572   :  { %2502 = vrcp.f32 %v1904_v42 }
 0x57b   :  { %v2501_v40 = vpop.eup %2500 }
 0x57c   :  { %v1925_v32 = vrot.slane %v2501_v40, 4  ;;  %v2503_v39 = vpop.eup %2502 }
 0x57e   :  { %v1927_v59 = vmul.f32 %v2503_v39, %v1925_v32 }
 0x580   :  { %v2026_v62 = vrot.slane %v1927_v59, %v2739_v43  ;;  %v2032_v23 = vrot.slane %v1927_v59, %v2741_v46  ;;  %v2038_v50 = vrot.slane %v1927_v59, %v2743_v47  ;;  %v3123_v20 = vsel %vm2127_vm6, %v3070_v44, %v1927_v59 }
 0x581   :  { %v2044_v6 = vrot.slane %v1927_v59, %v2745_v48 }
 0x582   :  { %v2027_v49 = vmul.f32 %v2026_v62, %v2712_v8  ;;  %v2033_v34 = vmul.f32 %v2032_v23, %v2714_v10  ;;  %v2039_v9 = vmul.f32 %v2038_v50, %v2720_v17  ;;  %v2034_v61 = vmul.f32 %v2032_v23, %v2749_v54 }
 0x583   :  { %v2045_v21 = vmul.f32 %v2044_v6, %v2722_v18  ;;  %v2040_v44 = vmul.f32 %v2038_v50, %v2747_v51  ;;  %v2028_v8 = vmul.f32 %v2026_v62, %v2737_v38  ;;  %v2046_v17 = vmul.f32 %v2044_v6, %v2787_v16  ;;  %v2131_v18 = vld [vmem:[%s3189_s7] sm:$0x1]  ;;  %s2557_s7 = smov [#allocation3]  }
 0x584   :  { %2053 = vrot.lane.b32.xlu1 %v2027_v49, %s2556_s6  ;;  %v2061_v60 = vadd.f32 %v2039_v9, %v2033_v34  ;;  %v2132_v51 = vld [vmem:[#allocation2] sm:$0x1]  ;;  %s2200_s11 = sshll.u32 %s2557_s7, 4  ;;  %s2201_s11 = int_to_ptr.vmem [resolvable:$true] %s2200_s11 }
 0x585   :  { %v2062_v10 = vadd.f32 %v2040_v44, %v2034_v61  ;;  %s2528_s12 = scalar_lea.vmem %s2201_s11, 16  ;;  %s2532_s13 = scalar_lea.vmem %s2201_s11, 32 }
 0x586   :  { %2067 = vrot.lane.b32.xlu0 %v2061_v60, %s2556_s6  ;;  %p2529_p0 = scmp.ne.s32.totalorder %s2201_s11, %s2528_s12  ;;  %p2533_p1 = scmp.lt.s32.totalorder %s2201_s11, %s2201_s11 }
 0x587   :  { %p2534_p2 = scmp.lt.s32.totalorder %s2532_s13, %s2528_s12 }
 0x588   :  { %2079 = vrot.lane.b32.xlu1 %v2045_v21, %s2556_s6 }
 0x589   :  { %p2535_p3 = por %p2534_p2, %p2533_p1 }
 0x58a   :  { %2055 = vrot.lane.b32.xlu0 %v2028_v8, %s2556_s6 }
 0x58b   :  { %p2536_p4 = pnand %p2535_p3, %p2529_p0 }
 0x58c   :  { %2069 = vrot.lane.b32.xlu1 %v2062_v10, %s2556_s6 }
 0x58e   :  { %2081 = vrot.lane.b32.xlu0 %v2046_v17, %s2556_s6 }
 0x590   :  { %2101 = vrot.lane.b32.xlu1 %v1922_v56, %s2556_s6 }
 0x592   :  { %2162 = vperm.xlu0 %2328, %v2131_v18  }
 0x594   :  { %2153 = vperm.xlu1 %2331, %v2131_v18  }
 0x596   :  { %2332 = vset.pattern.permute.xlu0 %v2553_v19 }
 0x597   :  { %2144 = vperm.xlu0 %2332, %v2131_v18  }
 0x598   :  { %2333 = vset.pattern.permute.xlu1 %v2553_v19 }
 0x599   :  { %2135 = vperm.xlu1 %2333, %v2132_v51  }
 0x59b   :  { %2335 = vset.pattern.permute.xlu0 %v2555_v29 }
 0x59d   :  { %2334 = vset.pattern.permute.xlu1 %v2555_v29 }
 0x59e   :  { %2171 = vperm.xlu1 %2334, %v2131_v18  }
 0x5ae   :  { %v1939_v38 = vpop.permute.xlu0 %1938 }
 0x5af   :  { %v1944_v54 = vadd.f32 %v2697_v55, %v1939_v38 }
 0x5b0   :  { %v1951_v16 = vpop.permute.xlu1 %1950 }
 0x5b1   :  { %v1956_v2 = vadd.f32 %v1951_v16, %v1944_v54 }
 0x5b2   :  { %v1961_v1 = vpop.permute.xlu0 %1960 }
 0x5b3   :  { %v1966_v25 = vadd.f32 %v1961_v1, %v1956_v2 }
 0x5b4   :  { %v1941_v63 = vpop.permute.xlu1 %1940 }
 0x5b5   :  { %v2236_v22 = vmul.f32 -1.442695, %v1966_v25  ;;  %v1945_v5 = vadd.f32 %v2694_v53, %v1941_v63 }
 0x5b6   :  { %v1953_v0 = vpop.permute.xlu0 %1952 }
 0x5b7   :  { %2504 = vpow2.f32 %v2236_v22  ;;  %v1957_v19 = vadd.f32 %v1953_v0, %v1945_v5 }
 0x5b8   :  { %v1963_v13 = vpop.permute.xlu1 %1962 }
 0x5b9   :  { %v1967_v11 = vadd.f32 %v1963_v13, %v1957_v19 }
 0x5ba   :  { %v1983_v41 = vpop.permute.xlu0 %1982 }
 0x5bb   :  { %2506 = vtanh.f32 %v1967_v11  ;;  %v2237_v58 = vmul.f32 -1.442695, %v1967_v11 }
 0x5c1   :  { %v2505_v7 = vpop.eup %2504 }
 0x5c2   :  { %v1974_v29 = vadd.f32 1.0, %v2505_v7 }
 0x5c4   :  { %2508 = vrcp.f32 %v1974_v29 }
 0x5c5   :  { %v2507_v3 = vpop.eup %2506  ;;  %2510 = vpow2.f32 %v2237_v58 }
 0x5c6   :  { %v1987_v55 = vrot.slane %v2507_v3, 4 }
 0x5ce   :  { %v2509_v30 = vpop.eup %2508 }
 0x5cf   :  { %v1989_v26 = vmul.f32 %v2509_v30, %v1987_v55  ;;  %v1985_v37 = vmul.f32 %v2509_v30, %v1983_v41  ;;  %v2511_v53 = vpop.eup %2510 }
 0x5d0   :  { %v1975_v12 = vadd.f32 1.0, %v2511_v53 }
 0x5d1   :  { %v1991_v36 = vrot.slane %v1989_v26, 4 }
 0x5d3   :  { %v1993_v52 = vadd.f32 %v1991_v36, %v1985_v37 }
 0x5d5   :  { %2512 = vtanh.f32 %v1993_v52 }
 0x5d6   :  { %2514 = vrcp.f32 %v1975_v12 }
 0x5df   :  { %v2513_v45 = vpop.eup %2512 }
 0x5e0   :  { %v1996_v42 = vrot.slane %v2513_v45, 4  ;;  %v2515_v56 = vpop.eup %2514 }
 0x5e2   :  { %v1998_v40 = vmul.f32 %v2515_v56, %v1996_v42 }
 0x5e4   :  { %v2002_v32 = vrot.slane %v1998_v40, %v2739_v43  ;;  %v2008_v39 = vrot.slane %v1998_v40, %v2741_v46  ;;  %v2014_v59 = vrot.slane %v1998_v40, %v2743_v47  ;;  %v2020_v62 = vrot.slane %v1998_v40, %v2745_v48 }
 0x5e6   :  { %v2003_v23 = vmul.f32 %v2002_v32, %v2724_v24  ;;  %v2009_v50 = vmul.f32 %v2008_v39, %v2701_v57  ;;  %v2015_v49 = vmul.f32 %v2014_v59, %v2709_v4  ;;  %v2021_v34 = vmul.f32 %v2020_v62, %v2716_v14 }
 0x5e7   :  { %v2004_v46 = vmul.f32 %v2002_v32, %v2731_v31  ;;  %v2010_v47 = vmul.f32 %v2008_v39, %v2726_v27  ;;  %v2016_v48 = vmul.f32 %v2014_v59, %v2733_v33  ;;  %v2022_v4 = vmul.f32 %v2020_v62, %v2735_v35 }
 0x5e8   :  { %v2047_v9 = vadd.f32 %v2003_v23, %v2718_v15  ;;  %v2049_v6 = vadd.f32 %v2015_v49, %v2009_v50 }
 0x5e9   :  { %v2048_v14 = vadd.f32 %v2004_v46, %v2774_v28  ;;  %v2050_v15 = vadd.f32 %v2016_v48, %v2010_v47 }
 0x5ea   :  { %v2063_v24 = vadd.f32 %v2049_v6, %v2047_v9 }
 0x5eb   :  { %v2064_v31 = vadd.f32 %v2050_v15, %v2048_v14 }
 0x5f6   :  { %v2054_v60 = vpop.permute.xlu1 %2053 }
 0x5f7   :  { %v2059_v21 = vadd.f32 %v2054_v60, %v2021_v34 }
 0x5f8   :  { %v2068_v61 = vpop.permute.xlu0 %2067 }
 0x5f9   :  { %v2073_v44 = vadd.f32 %v2068_v61, %v2059_v21 }
 0x5fa   :  { %v2080_v8 = vpop.permute.xlu1 %2079 }
 0x5fb   :  { %v2075_v57 = vadd.f32 %v2073_v44, %v2063_v24 }
 0x5fc   :  { %v2056_v10 = vpop.permute.xlu0 %2055 }
 0x5fd   :  { %v2085_v17 = vadd.f32 %v2080_v8, %v2075_v57  ;;  %v2060_v18 = vadd.f32 %v2056_v10, %v2022_v4 }
 0x5fe   :  { %v2070_v51 = vpop.permute.xlu1 %2069 }
 0x5ff   :  { %v2238_v38 = vmul.f32 -1.442695, %v2085_v17  ;;  %v2074_v54 = vadd.f32 %v2070_v51, %v2060_v18 }
 0x600   :  { %v2082_v16 = vpop.permute.xlu0 %2081 }
 0x601   :  { %2516 = vpow2.f32 %v2238_v38  ;;  %v2076_v27 = vadd.f32 %v2074_v54, %v2064_v31 }
 0x602   :  { %v2102_v0 = vpop.permute.xlu1 %2101 }
 0x603   :  { %v2086_v33 = vadd.f32 %v2082_v16, %v2076_v27 }
 0x605   :  { %2518 = vtanh.f32 %v2086_v33  ;;  %v2239_v25 = vmul.f32 -1.442695, %v2086_v33 }
 0x60b   :  { %v2517_v2 = vpop.eup %2516 }
 0x60c   :  { %v2093_v1 = vadd.f32 1.0, %v2517_v2 }
 0x60e   :  { %2520 = vrcp.f32 %v2093_v1 }
 0x60f   :  { %2522 = vpow2.f32 %v2239_v25  ;;  %v2519_v35 = vpop.eup %2518 }
 0x610   :  { %v2106_v63 = vrot.slane %v2519_v35, 4 }
 0x611   :  { %v2163_v58 = vpop.permute.xlu0 %2162 }
 0x612   :  { %v2168_v52 = vrot.slane %v2163_v58, %v2739_v43 }
 0x613   :  { %v2154_v29 = vpop.permute.xlu1 %2153 }
 0x614   :  { %v2159_v42 = vrot.slane %v2154_v29, %v2739_v43 }
 0x616   :  { %v2145_v26 = vpop.permute.xlu0 %2144 }
 0x617   :  { %v2150_v53 = vrot.slane %v2145_v26, %v2739_v43 }
 0x618   :  { %v2521_v28 = vpop.eup %2520  ;;  %v2136_v3 = vpop.permute.xlu1 %2135 }
 0x619   :  { %v2108_v22 = vmul.f32 %v2521_v28, %v2106_v63  ;;  %v2523_v5 = vpop.eup %2522  ;;  %v2104_v13 = vmul.f32 %v2521_v28, %v2102_v0  ;;  %v2141_v39 = vrot.slane %v2136_v3, %v2739_v43 }
 0x61a   :  { %v2094_v11 = vadd.f32 1.0, %v2523_v5 }
 0x61b   :  { %v2110_v19 = vrot.slane %v2108_v22, 4 }
 0x61d   :  { %v2112_v7 = vadd.f32 %v2110_v19, %v2104_v13  ;;  %v2172_v37 = vpop.permute.xlu1 %2171 }
 0x61e   :  { %v2177_v56 = vrot.slane %v2172_v37, %v2739_v43 }
 0x61f   :  { %2524 = vtanh.f32 %v2112_v7 }
 0x620   :  { %2526 = vrcp.f32 %v2094_v11 }
 0x629   :  { %v2525_v55 = vpop.eup %2524 }
 0x62a   :  { %v2115_v30 = vrot.slane %v2525_v55, 4  ;;  %v2527_v41 = vpop.eup %2526 }
 0x62c   :  { %v2117_v36 = vmul.f32 %v2527_v41, %v2115_v30 }
 0x62e   :  { %v2130_v12 = vsel %vm2129_vm7, %v3123_v20, %v2117_v36 }
 0x62f   :  { %v2169_v45 = vmul.f32 %v2168_v52, %v2130_v12  ;;  %v2160_v32 = vmul.f32 %v2159_v42, %v2130_v12  ;;  %v2151_v59 = vmul.f32 %v2150_v53, %v2130_v12  ;;  %v2178_v23 = vmul.f32 %v2177_v56, %v2130_v12 }
 0x631   :  { %v2181_v40 = vrot.slane %v2169_v45, 1  ;;  %v2179_v49 = vadd.f32 %v2151_v59, %v2141_v39  ;;  %v2189_v34 = vrot.slane %v2178_v23, 3 }
 0x633   :  { %v2183_v62 = vadd.f32 %v2181_v40, %v2160_v32 }
 0x635   :  { %v2185_v50 = vrot.slane %v2183_v62, 1 }
 0x637   :  { %v2187_v9 = vadd.f32 %v2185_v50, %v2179_v49 }
 0x639   :  { %v2191_v20 = vadd.f32 %v2189_v34, %v2187_v9 }
 0x63b   :  { %2193 = vst.msk [vmem:[#allocation3] sm:$0x1] %vm2192_vm8, %v2191_v20 }
 0x63c   :  { %2539 = shalt.err (!%p2536_p4)
}
 0x63d   :  { %s2540_s16 = scalar_lea.hbm %s3191_s9, 16 }
 0x63e   :  { %p2541_p5 = scmp.ne.s32.totalorder %s3191_s9, %s2540_s16  ;;  %p2544_p6 = scmp.lt.u32.totalorder %s2540_s16, %s3191_s9 }
 0x640   :  { %p2546_p7 = pnand %p2544_p6, %p2541_p5 }
 0x642   :  { %2549 = shalt.err (!%p2546_p7)
}
 0x643   :  { %2203 = dma.vmem_to_hbm [thread:$0]  %s2201_s11, 16, %s3191_s9, [#allocation4]  }
 0x644   :  { %2550 = dma.done.wait [#allocation4], 16  }
 0x645   :  { %2551 = vsyncadd [#allocation4], 4294967280 }
 0x646   :  { %2207 = vsyncpa [#allocation4], 1 }

</bundles_post_ra>
